<compile_context>
chip_gen: v6e
topology: v6e:2x2x1
jax: 0.10.0
libtpu: 0.0.40
codegen_flags: <defaults>
</compile_context>

<pallas_src>
import functools
import math

import jax
import jax.numpy as jnp
from jax.experimental import pallas as pl
from jax.experimental.pallas import tpu as pltpu


def _round_up(x, m):
    return (x + m - 1) // m * m


def _pick_block_b(B, Lp):
    """Pick how many sequences to process per grid step."""
    target = max(1, 128 // Lp)          # aim for M ≈ 128 rows per matmul
    best = 1
    for d in range(1, B + 1):
        if B % d == 0 and d <= target:
            best = d
    # Keep >= 2 grid steps when possible so v7x megacore has work for both TCs.
    if B // best < 2 and best > 1:
        for d in range(best, 0, -1):
            if B % d == 0 and B // d >= 2:
                best = d
                break
    return best


# ----------------------------------------------------------------------------
# Pallas kernel: full Encoder forward for `Bt` sequences.
# ----------------------------------------------------------------------------
def _encoder_kernel(x_ref, wfc_ref, bfc_ref, wconv_ref, bconv_ref,
                    gamma_ref, beta_ref, out_ref, pad_ref, col_ref,
                    *, n_layers, kernel_size, hid_dim, seq_len, scale, eps,
                    compute_dtype):
    """Fused Encoder forward.

    x_ref     : (Bt, Lp, Pp)   bf16    padded protein features
    wfc_ref   : (Pp, Hp)       bf16    fc weight (transposed, zero padded)
    bfc_ref   : (1, Hp)        f32     fc bias
    wconv_ref : (n_layers, K*Hp, 2*Hp) bf16  fused value|gate conv weights
    bconv_ref : (n_layers, 1, 2*Hp)    f32   fused conv bias
    gamma_ref : (1, Hp)        f32     LayerNorm weight (zero padded)
    beta_ref  : (1, Hp)        f32     LayerNorm bias   (zero padded)
    out_ref   : (Bt, Lp, Hp)   f32
    pad_ref   : (Bt*(Lp+2*pad), Hp)  bf16 VMEM  per-seq zero-padded residual
    col_ref   : (Bt*Lp, K*Hp)        bf16 VMEM  im2col buffer
    """
    Bt, Lp, Pp = x_ref.shape
    Hp = out_ref.shape[2]
    K = kernel_size
    pad = (K - 1) // 2
    M = Bt * Lp
    Lh = Lp + 2 * pad

    # ---- fc: (M, Pp) @ (Pp, Hp), f32 accumulation ----
    x = x_ref[...].reshape(M, Pp).astype(compute_dtype)
    h = jnp.dot(x, wfc_ref[...], preferred_element_type=jnp.float32)
    h = h + bfc_ref[...]

    need_row_mask = seq_len != Lp
    if need_row_mask:
        rows = jax.lax.broadcasted_iota(jnp.int32, (M, 1), 0)
        row_mask = ((rows % Lp) < seq_len).astype(jnp.float32)
        h = h * row_mask
    else:
        row_mask = None

    # Zero the padded residual scratch once; halo rows stay zero across layers.
    pad_ref[...] = jnp.zeros(pad_ref.shape, pad_ref.dtype)

    for layer in range(n_layers):
        # TODO(synk): nn.Dropout is identity at inference; training-mode
        # stochastic masks are intentionally not implemented.
        hc = h.astype(compute_dtype)
        for b in range(Bt):
            base = b * Lh
            pad_ref[base + pad: base + pad + Lp, :] = hc[b * Lp:(b + 1) * Lp, :]

        # im2col: K shifted copies at lane offsets k*Hp (lane-dense stores).
        for b in range(Bt):
            base = b * Lh
            r0 = b * Lp
            for k in range(K):
                col_ref[r0:r0 + Lp, k * Hp:(k + 1) * Hp] = \
                    pad_ref[base + k: base + k + Lp, :]

        # One fused conv matmul per layer: (M, K*Hp) @ (K*Hp, 2*Hp).
        z = jnp.dot(col_ref[...], wconv_ref[layer],
                    preferred_element_type=jnp.float32)
        z = z + bconv_ref[layer]

        # GLU over channels: value * sigmoid(gate)   (lane-aligned halves).
        conved = z[:, :Hp] * jax.nn.sigmoid(z[:, Hp:])
        # residual connection scaled by sqrt(0.5)
        h = (conved + h) * scale
        if need_row_mask:
            h = h * row_mask

    # ---- LayerNorm over the real hid_dim channels (padded channels are 0) ----
    inv_h = 1.0 / hid_dim
    mean = jnp.sum(h, axis=-1, keepdims=True) * inv_h
    centered = h - mean
    if hid_dim != Hp:
        ch = jax.lax.broadcasted_iota(jnp.int32, (1, Hp), 1)
        centered = centered * (ch < hid_dim).astype(jnp.float32)
    var = jnp.sum(centered * centered, axis=-1, keepdims=True) * inv_h
    hn = centered * jax.lax.rsqrt(var + eps)
    out = hn * gamma_ref[...] + beta_ref[...]
    out_ref[...] = out.reshape(Bt, Lp, Hp)


# ----------------------------------------------------------------------------
# Wrapper
# ----------------------------------------------------------------------------
def encoder_forward(protein, params, *, n_layers, kernel_size, hid_dim,
                    eps=1e-5, block_b=None):
    B, L, P = protein.shape
    Pp, Hp = params["w_fc"].shape
    K = kernel_size
    pad = (K - 1) // 2
    Lp = _round_up(L, 8)
    compute_dtype = params["w_fc"].dtype

    # Pad input to lane/sublane aligned shapes (in compute dtype to halve DMA).
    xp = protein.astype(compute_dtype)
    if Lp != L or Pp != P:
        xp = jnp.pad(xp, ((0, 0), (0, Lp - L), (0, Pp - P)))

    Bt = block_b if block_b is not None else _pick_block_b(B, Lp)
    assert B % Bt == 0, "block_b must divide the batch"
    steps = B // Bt
    M = Bt * Lp

    kernel = functools.partial(
        _encoder_kernel, n_layers=n_layers, kernel_size=K, hid_dim=hid_dim,
        seq_len=L, scale=float(math.sqrt(0.5)), eps=float(eps),
        compute_dtype=compute_dtype)

    # --- VMEM / cost bookkeeping ---
    cd = jnp.dtype(compute_dtype).itemsize
    per_buf = (Bt * Lp * Pp * cd            # x block
               + Bt * Lp * Hp * 4           # out block
               + Pp * Hp * cd + Hp * 4      # fc
               + n_layers * K * Hp * 2 * Hp * cd + n_layers * 2 * Hp * 4
               + 2 * Hp * 4)                # gamma, beta
    scratch_bytes = Bt * (Lp + 2 * pad) * Hp * cd + M * K * Hp * cd
    vmem_est = 2 * per_buf + scratch_bytes
    vmem_limit = int(min(64 << 20, max(vmem_est + (8 << 20), 16 << 20)))

    flops = int(2 * B * Lp * Pp * Hp
                + n_layers * 2 * B * Lp * (K * Hp) * (2 * Hp))
    transcendentals = int(B * Lp * Hp * n_layers + B * Lp)
    param_bytes = sum(int(a.size) * a.dtype.itemsize
                      for a in (params["w_fc"], params["b_fc"],
                                params["w_conv"], params["b_conv"],
                                params["gamma"], params["beta"]))
    bytes_accessed = int(xp.size) * cd + B * Lp * Hp * 4 + param_bytes

    out = pl.pallas_call(
        kernel,
        out_shape=jax.ShapeDtypeStruct((B, Lp, Hp), jnp.float32),
        grid=(steps,),
        in_specs=[
            pl.BlockSpec((Bt, Lp, Pp), lambda g: (g, 0, 0)),
            pl.BlockSpec((Pp, Hp), lambda g: (0, 0)),
            pl.BlockSpec((1, Hp), lambda g: (0, 0)),
            pl.BlockSpec((n_layers, K * Hp, 2 * Hp), lambda g: (0, 0, 0)),
            pl.BlockSpec((n_layers, 1, 2 * Hp), lambda g: (0, 0, 0)),
            pl.BlockSpec((1, Hp), lambda g: (0, 0)),
            pl.BlockSpec((1, Hp), lambda g: (0, 0)),
        ],
        out_specs=pl.BlockSpec((Bt, Lp, Hp), lambda g: (g, 0, 0)),
        scratch_shapes=[
            pltpu.VMEM((Bt * (Lp + 2 * pad), Hp), compute_dtype),
            pltpu.VMEM((M, K * Hp), compute_dtype),
        ],
        compiler_params=pltpu.CompilerParams(
            dimension_semantics=("parallel",),
            vmem_limit_bytes=vmem_limit),
        cost_estimate=pl.CostEstimate(
            flops=flops, transcendentals=transcendentals,
            bytes_accessed=bytes_accessed),
    )(xp, params["w_fc"], params["b_fc"], params["w_conv"], params["b_conv"],
      params["gamma"], params["beta"])

    return out[:, :L, :hid_dim]


# ----------------------------------------------------------------------------
# Parameter packing (padding to 128 lanes, fusing value|gate, bf16 weights)
# ----------------------------------------------------------------------------
def pack_encoder_params(raw, kernel_size, compute_dtype=jnp.bfloat16):
    H, P = raw["w_fc"].shape
    n_layers = raw["w_conv"].shape[0]
    K = kernel_size
    Hp = _round_up(H, 128)
    Pp = _round_up(P, 128)

    w_fc = jnp.zeros((Pp, Hp), jnp.float32).at[:P, :H].set(raw["w_fc"].T)
    b_fc = jnp.zeros((1, Hp), jnp.float32).at[0, :H].set(raw["b_fc"])

    w_conv = jnp.zeros((n_layers, K * Hp, 2 * Hp), jnp.float32)
    b_conv = jnp.zeros((n_layers, 1, 2 * Hp), jnp.float32)
    for i in range(n_layers):
        for k in range(K):
            tap = raw["w_conv"][i, :, :, k].T        # (H_in, 2H_out)
            w_conv = w_conv.at[i, k * Hp:k * Hp + H, :H].set(tap[:, :H])
            w_conv = w_conv.at[i, k * Hp:k * Hp + H, Hp:Hp + H].set(tap[:, H:])
        b_conv = b_conv.at[i, 0, :H].set(raw["b_conv"][i, :H])
        b_conv = b_conv.at[i, 0, Hp:Hp + H].set(raw["b_conv"][i, H:])

    gamma = jnp.zeros((1, Hp), jnp.float32).at[0, :H].set(raw["gamma"])
    beta = jnp.zeros((1, Hp), jnp.float32).at[0, :H].set(raw["beta"])

    return dict(w_fc=w_fc.astype(compute_dtype), b_fc=b_fc,
                w_conv=w_conv.astype(compute_dtype), b_conv=b_conv,
                gamma=gamma, beta=beta)


# ----------------------------------------------------------------------------
# Pure-JAX f32 reference (mirrors PyTorch Encoder.forward in eval mode)
# ----------------------------------------------------------------------------
def encoder_reference(protein, raw, *, n_layers, kernel_size, eps=1e-5):
    scale = math.sqrt(0.5)
    pad = (kernel_size - 1) // 2
    h = protein @ raw["w_fc"].T + raw["b_fc"]                 # (B, L, H)
    L, H = h.shape[1], h.shape[2]
    for i in range(n_layers):
        wc = raw["w_conv"][i]                                 # (2H, H, K)
        bc = raw["b_conv"][i]                                 # (2H,)
        hp = jnp.pad(h, ((0, 0), (pad, pad), (0, 0)))
        z = jnp.zeros(h.shape[:2] + (2 * H,), jnp.float32)
        for k in range(kernel_size):
            z = z + hp[:, k:k + L, :] @ wc[:, :, k].T
        z = z + bc
        conved = z[..., :H] * jax.nn.sigmoid(z[..., H:])
        h = (conved + h) * scale
    mean = jnp.mean(h, axis=-1, keepdims=True)
    var = jnp.mean((h - mean) ** 2, axis=-1, keepdims=True)
    hn = (h - mean) / jnp.sqrt(var + eps)
    return hn * raw["gamma"] + raw["beta"]


# ----------------------------------------------------------------------------
# Encoder (JAX/Pallas) with PyTorch-style parameter initialization
# ----------------------------------------------------------------------------
class EncoderPallas:
    def __init__(self, protein_dim, hid_dim, n_layers, kernel_size,
                 dropout=0.0, seed=0, compute_dtype=jnp.bfloat16):
        assert kernel_size % 2 == 1, "Kernel size must be odd (for now)"
        self.protein_dim = protein_dim
        self.hid_dim = hid_dim
        self.n_layers = n_layers
        self.kernel_size = kernel_size
        self.dropout = dropout  # identity at inference

        key = jax.random.PRNGKey(seed)
        keys = jax.random.split(key, 2 + 2 * n_layers)

        # nn.Linear(protein_dim, hid_dim) default init
        bound_fc = 1.0 / math.sqrt(protein_dim)
        w_fc = jax.random.uniform(keys[0], (hid_dim, protein_dim), jnp.float32,
                                  -bound_fc, bound_fc)
        b_fc = jax.random.uniform(keys[1], (hid_dim,), jnp.float32,
                                  -bound_fc, bound_fc)

        # nn.Conv1d(hid_dim, 2*hid_dim, kernel_size) default init, per layer
        bound_c = 1.0 / math.sqrt(hid_dim * kernel_size)
        w_conv, b_conv = [], []
        for i in range(n_layers):
            w_conv.append(jax.random.uniform(
                keys[2 + 2 * i], (2 * hid_dim, hid_dim, kernel_size),
                jnp.float32, -bound_c, bound_c))
            b_conv.append(jax.random.uniform(
                keys[3 + 2 * i], (2 * hid_dim,), jnp.float32,
                -bound_c, bound_c))

        self.raw = dict(
            w_fc=w_fc, b_fc=b_fc,
            w_conv=jnp.stack(w_conv), b_conv=jnp.stack(b_conv),
            gamma=jnp.ones((hid_dim,), jnp.float32),
            beta=jnp.zeros((hid_dim,), jnp.float32))

        self.params = pack_encoder_params(self.raw, kernel_size,
                                          compute_dtype=compute_dtype)

    def forward(self, protein):
        return encoder_forward(protein, self.params,
                               n_layers=self.n_layers,
                               kernel_size=self.kernel_size,
                               hid_dim=self.hid_dim)


# ----------------------------------------------------------------------------
if __name__ == "__main__":
    B = 2            # batch
    L = 16           # protein sequence length
    PROT_DIM = 64    # raw protein feature dim
    HID_DIM = 32     # encoder hidden dim
    N_LAYERS = 3
    KERNEL_SIZE = 5  # must be odd

    key = jax.random.PRNGKey(0)
    protein = jax.random.normal(key, (B, L, PROT_DIM), jnp.float32)

    model = EncoderPallas(PROT_DIM, HID_DIM, N_LAYERS, KERNEL_SIZE,
                          dropout=0.0, seed=0)

    out = jax.block_until_ready(model.forward(protein))
    ref = jax.block_until_ready(
        encoder_reference(protein, model.raw,
                          n_layers=N_LAYERS, kernel_size=KERNEL_SIZE))

    assert out.shape == (B, L, HID_DIM)
    assert bool(jnp.all(jnp.isfinite(out)))
    max_err = float(jnp.max(jnp.abs(out - ref)))
    # bf16 MXU operands (f32 accumulation) -> small numerical difference vs
    # the pure-f32 reference.
    assert max_err < 3e-2, max_err
    print("KERNEL_OK")
</pallas_src>

<mosaic_0001>
module attributes {stable_mosaic.version = 11 : i64} {
  func.func @_encoder_kernel(%arg0: i32, %arg1: memref<1x16x128xbf16, #tpu.memory_space<vmem>>, %arg2: memref<128x128xbf16, #tpu.memory_space<vmem>>, %arg3: memref<1x128xf32, #tpu.memory_space<vmem>>, %arg4: memref<3x640x256xbf16, #tpu.memory_space<vmem>>, %arg5: memref<3x1x256xf32, #tpu.memory_space<vmem>>, %arg6: memref<1x128xf32, #tpu.memory_space<vmem>>, %arg7: memref<1x128xf32, #tpu.memory_space<vmem>>, %arg8: memref<1x16x128xf32, #tpu.memory_space<vmem>>, %arg9: memref<20x128xbf16, #tpu.memory_space<vmem>>, %arg10: memref<16x640xbf16, #tpu.memory_space<vmem>>) attributes {dimension_semantics = [#tpu.dimension_semantics<parallel>], iteration_bounds = array<i64: 2>, scalar_prefetch = 0 : i64, scratch_operands = 2 : i64, tpu.core_type = #tpu.core_type<tc>, window_params = [{transform_indices = @transform_0, window_bounds = array<i64: 1, 16, 128>}, {pipeline_mode = #tpu.pipeline_mode<synchronous>, transform_indices = @transform_1, window_bounds = array<i64: 128, 128>}, {pipeline_mode = #tpu.pipeline_mode<synchronous>, transform_indices = @transform_2, window_bounds = array<i64: 1, 128>}, {pipeline_mode = #tpu.pipeline_mode<synchronous>, transform_indices = @transform_3, window_bounds = array<i64: 3, 640, 256>}, {pipeline_mode = #tpu.pipeline_mode<synchronous>, transform_indices = @transform_4, window_bounds = array<i64: 3, 1, 256>}, {pipeline_mode = #tpu.pipeline_mode<synchronous>, transform_indices = @transform_5, window_bounds = array<i64: 1, 128>}, {pipeline_mode = #tpu.pipeline_mode<synchronous>, transform_indices = @transform_6, window_bounds = array<i64: 1, 128>}, {transform_indices = @transform_7, window_bounds = array<i64: 1, 16, 128>}]} {
    %c0 = arith.constant 0 : index
    %c0_0 = arith.constant 0 : index
    %c0_1 = arith.constant 0 : index
    %0 = vector.load %arg1[%c0, %c0_0, %c0_1] : memref<1x16x128xbf16, #tpu.memory_space<vmem>>, vector<1x16x128xbf16>
    %1 = vector.shape_cast %0 : vector<1x16x128xbf16> to vector<16x128xbf16>
    %c0_2 = arith.constant 0 : index
    %c0_3 = arith.constant 0 : index
    %2 = vector.load %arg2[%c0_2, %c0_3] : memref<128x128xbf16, #tpu.memory_space<vmem>>, vector<128x128xbf16>
    %cst = arith.constant dense<0.000000e+00> : vector<16x128xf32>
    %3 = tpu.matmul %1, %2, %cst {dimension_numbers = #tpu.dot_dimension_numbers<[1], [0], [0], [1], [0, 0, 1, 1], [], []>} : vector<16x128xbf16>, vector<128x128xbf16>, vector<16x128xf32> -> vector<16x128xf32>
    %c0_4 = arith.constant 0 : index
    %c0_5 = arith.constant 0 : index
    %4 = vector.load %arg3[%c0_4, %c0_5] : memref<1x128xf32, #tpu.memory_space<vmem>>, vector<1x128xf32>
    %5 = vector.broadcast %4 : vector<1x128xf32> to vector<16x128xf32>
    %6 = arith.addf %3, %5 : vector<16x128xf32>
    %cst_6 = arith.constant 0.000000e+00 : bf16
    %7 = vector.broadcast %cst_6 : bf16 to vector<20x128xbf16>
    %c0_7 = arith.constant 0 : index
    %c0_8 = arith.constant 0 : index
    %8 = vector.load %arg9[%c0_7, %c0_8] : memref<20x128xbf16, #tpu.memory_space<vmem>>, vector<20x128xbf16>
    tpu.vector_store %arg9[%c0_7, %c0_8], %7 {strides = array<i32>} : memref<20x128xbf16, #tpu.memory_space<vmem>>, vector<20x128xbf16>,
    %9 = arith.truncf %6 : vector<16x128xf32> to vector<16x128xbf16>
    %c2 = arith.constant 2 : index
    %c0_9 = arith.constant 0 : index
    %10 = vector.load %arg9[%c2, %c0_9] : memref<20x128xbf16, #tpu.memory_space<vmem>>, vector<16x128xbf16>
    tpu.vector_store %arg9[%c2, %c0_9], %9 {strides = array<i32>} : memref<20x128xbf16, #tpu.memory_space<vmem>>, vector<16x128xbf16>,
    %c0_10 = arith.constant 0 : index
    %c0_11 = arith.constant 0 : index
    %11 = vector.load %arg9[%c0_10, %c0_11] : memref<20x128xbf16, #tpu.memory_space<vmem>>, vector<16x128xbf16>
    %c0_12 = arith.constant 0 : index
    %c0_13 = arith.constant 0 : index
    %12 = vector.load %arg10[%c0_12, %c0_13] : memref<16x640xbf16, #tpu.memory_space<vmem>>, vector<16x128xbf16>
    tpu.vector_store %arg10[%c0_12, %c0_13], %11 {strides = array<i32>} : memref<16x640xbf16, #tpu.memory_space<vmem>>, vector<16x128xbf16>,
    %c1 = arith.constant 1 : index
    %c0_14 = arith.constant 0 : index
    %13 = vector.load %arg9[%c1, %c0_14] : memref<20x128xbf16, #tpu.memory_space<vmem>>, vector<16x128xbf16>
    %c0_15 = arith.constant 0 : index
    %c128 = arith.constant 128 : index
    %14 = vector.load %arg10[%c0_15, %c128] : memref<16x640xbf16, #tpu.memory_space<vmem>>, vector<16x128xbf16>
    tpu.vector_store %arg10[%c0_15, %c128], %13 {strides = array<i32>} : memref<16x640xbf16, #tpu.memory_space<vmem>>, vector<16x128xbf16>,
    %c2_16 = arith.constant 2 : index
    %c0_17 = arith.constant 0 : index
    %15 = vector.load %arg9[%c2_16, %c0_17] : memref<20x128xbf16, #tpu.memory_space<vmem>>, vector<16x128xbf16>
    %c0_18 = arith.constant 0 : index
    %c256 = arith.constant 256 : index
    %16 = vector.load %arg10[%c0_18, %c256] : memref<16x640xbf16, #tpu.memory_space<vmem>>, vector<16x128xbf16>
    tpu.vector_store %arg10[%c0_18, %c256], %15 {strides = array<i32>} : memref<16x640xbf16, #tpu.memory_space<vmem>>, vector<16x128xbf16>,
    %c3 = arith.constant 3 : index
    %c0_19 = arith.constant 0 : index
    %17 = vector.load %arg9[%c3, %c0_19] : memref<20x128xbf16, #tpu.memory_space<vmem>>, vector<16x128xbf16>
    %c0_20 = arith.constant 0 : index
    %c384 = arith.constant 384 : index
    %18 = vector.load %arg10[%c0_20, %c384] : memref<16x640xbf16, #tpu.memory_space<vmem>>, vector<16x128xbf16>
    tpu.vector_store %arg10[%c0_20, %c384], %17 {strides = array<i32>} : memref<16x640xbf16, #tpu.memory_space<vmem>>, vector<16x128xbf16>,
    %c4 = arith.constant 4 : index
    %c0_21 = arith.constant 0 : index
    %19 = vector.load %arg9[%c4, %c0_21] : memref<20x128xbf16, #tpu.memory_space<vmem>>, vector<16x128xbf16>
    %c0_22 = arith.constant 0 : index
    %c512 = arith.constant 512 : index
    %20 = vector.load %arg10[%c0_22, %c512] : memref<16x640xbf16, #tpu.memory_space<vmem>>, vector<16x128xbf16>
    tpu.vector_store %arg10[%c0_22, %c512], %19 {strides = array<i32>} : memref<16x640xbf16, #tpu.memory_space<vmem>>, vector<16x128xbf16>,
    %c0_23 = arith.constant 0 : index
    %c0_24 = arith.constant 0 : index
    %21 = vector.load %arg10[%c0_23, %c0_24] : memref<16x640xbf16, #tpu.memory_space<vmem>>, vector<16x640xbf16>
    %c0_25 = arith.constant 0 : index
    %c0_26 = arith.constant 0 : index
    %c0_27 = arith.constant 0 : index
    %22 = vector.load %arg4[%c0_25, %c0_26, %c0_27] : memref<3x640x256xbf16, #tpu.memory_space<vmem>>, vector<1x640x256xbf16>
    %23 = vector.shape_cast %22 : vector<1x640x256xbf16> to vector<640x256xbf16>
    %cst_28 = arith.constant dense<0.000000e+00> : vector<16x256xf32>
    %24 = tpu.matmul %21, %23, %cst_28 {dimension_numbers = #tpu.dot_dimension_numbers<[1], [0], [0], [1], [0, 0, 1, 1], [], []>} : vector<16x640xbf16>, vector<640x256xbf16>, vector<16x256xf32> -> vector<16x256xf32>
    %c0_29 = arith.constant 0 : index
    %c0_30 = arith.constant 0 : index
    %c0_31 = arith.constant 0 : index
    %25 = vector.load %arg5[%c0_29, %c0_30, %c0_31] : memref<3x1x256xf32, #tpu.memory_space<vmem>>, vector<1x1x256xf32>
    %26 = vector.shape_cast %25 : vector<1x1x256xf32> to vector<1x256xf32>
    %27 = vector.broadcast %26 : vector<1x256xf32> to vector<16x256xf32>
    %28 = arith.addf %24, %27 : vector<16x256xf32>
    %29 = vector.extract_strided_slice %28 {offsets = [0, 0], sizes = [16, 128], strides = [1, 1]} : vector<16x256xf32> to vector<16x128xf32>
    %30 = vector.extract_strided_slice %28 {offsets = [0, 128], sizes = [16, 128], strides = [1, 1]} : vector<16x256xf32> to vector<16x128xf32>
    %31 = arith.negf %30 : vector<16x128xf32>
    %32 = math.exp %31 : vector<16x128xf32>
    %cst_32 = arith.constant 1.000000e+00 : f32
    %33 = vector.broadcast %cst_32 : f32 to vector<16x128xf32>
    %34 = arith.addf %33, %32 : vector<16x128xf32>
    %35 = arith.divf %33, %34 : vector<16x128xf32>
    %36 = arith.mulf %29, %35 : vector<16x128xf32>
    %37 = arith.addf %36, %6 : vector<16x128xf32>
    %cst_33 = arith.constant 0.707106769 : f32
    %38 = vector.broadcast %cst_33 : f32 to vector<16x128xf32>
    %39 = arith.mulf %37, %38 : vector<16x128xf32>
    %40 = arith.truncf %39 : vector<16x128xf32> to vector<16x128xbf16>
    %c2_34 = arith.constant 2 : index
    %c0_35 = arith.constant 0 : index
    %41 = vector.load %arg9[%c2_34, %c0_35] : memref<20x128xbf16, #tpu.memory_space<vmem>>, vector<16x128xbf16>
    tpu.vector_store %arg9[%c2_34, %c0_35], %40 {strides = array<i32>} : memref<20x128xbf16, #tpu.memory_space<vmem>>, vector<16x128xbf16>,
    %c0_36 = arith.constant 0 : index
    %c0_37 = arith.constant 0 : index
    %42 = vector.load %arg9[%c0_36, %c0_37] : memref<20x128xbf16, #tpu.memory_space<vmem>>, vector<16x128xbf16>
    %c0_38 = arith.constant 0 : index
    %c0_39 = arith.constant 0 : index
    %43 = vector.load %arg10[%c0_38, %c0_39] : memref<16x640xbf16, #tpu.memory_space<vmem>>, vector<16x128xbf16>
    tpu.vector_store %arg10[%c0_38, %c0_39], %42 {strides = array<i32>} : memref<16x640xbf16, #tpu.memory_space<vmem>>, vector<16x128xbf16>,
    %c1_40 = arith.constant 1 : index
    %c0_41 = arith.constant 0 : index
    %44 = vector.load %arg9[%c1_40, %c0_41] : memref<20x128xbf16, #tpu.memory_space<vmem>>, vector<16x128xbf16>
    %c0_42 = arith.constant 0 : index
    %c128_43 = arith.constant 128 : index
    %45 = vector.load %arg10[%c0_42, %c128_43] : memref<16x640xbf16, #tpu.memory_space<vmem>>, vector<16x128xbf16>
    tpu.vector_store %arg10[%c0_42, %c128_43], %44 {strides = array<i32>} : memref<16x640xbf16, #tpu.memory_space<vmem>>, vector<16x128xbf16>,
    %c2_44 = arith.constant 2 : index
    %c0_45 = arith.constant 0 : index
    %46 = vector.load %arg9[%c2_44, %c0_45] : memref<20x128xbf16, #tpu.memory_space<vmem>>, vector<16x128xbf16>
    %c0_46 = arith.constant 0 : index
    %c256_47 = arith.constant 256 : index
    %47 = vector.load %arg10[%c0_46, %c256_47] : memref<16x640xbf16, #tpu.memory_space<vmem>>, vector<16x128xbf16>
    tpu.vector_store %arg10[%c0_46, %c256_47], %46 {strides = array<i32>} : memref<16x640xbf16, #tpu.memory_space<vmem>>, vector<16x128xbf16>,
    %c3_48 = arith.constant 3 : index
    %c0_49 = arith.constant 0 : index
    %48 = vector.load %arg9[%c3_48, %c0_49] : memref<20x128xbf16, #tpu.memory_space<vmem>>, vector<16x128xbf16>
    %c0_50 = arith.constant 0 : index
    %c384_51 = arith.constant 384 : index
    %49 = vector.load %arg10[%c0_50, %c384_51] : memref<16x640xbf16, #tpu.memory_space<vmem>>, vector<16x128xbf16>
    tpu.vector_store %arg10[%c0_50, %c384_51], %48 {strides = array<i32>} : memref<16x640xbf16, #tpu.memory_space<vmem>>, vector<16x128xbf16>,
    %c4_52 = arith.constant 4 : index
    %c0_53 = arith.constant 0 : index
    %50 = vector.load %arg9[%c4_52, %c0_53] : memref<20x128xbf16, #tpu.memory_space<vmem>>, vector<16x128xbf16>
    %c0_54 = arith.constant 0 : index
    %c512_55 = arith.constant 512 : index
    %51 = vector.load %arg10[%c0_54, %c512_55] : memref<16x640xbf16, #tpu.memory_space<vmem>>, vector<16x128xbf16>
    tpu.vector_store %arg10[%c0_54, %c512_55], %50 {strides = array<i32>} : memref<16x640xbf16, #tpu.memory_space<vmem>>, vector<16x128xbf16>,
    %c0_56 = arith.constant 0 : index
    %c0_57 = arith.constant 0 : index
    %52 = vector.load %arg10[%c0_56, %c0_57] : memref<16x640xbf16, #tpu.memory_space<vmem>>, vector<16x640xbf16>
    %c1_58 = arith.constant 1 : index
    %c0_59 = arith.constant 0 : index
    %c0_60 = arith.constant 0 : index
    %53 = vector.load %arg4[%c1_58, %c0_59, %c0_60] : memref<3x640x256xbf16, #tpu.memory_space<vmem>>, vector<1x640x256xbf16>
    %54 = vector.shape_cast %53 : vector<1x640x256xbf16> to vector<640x256xbf16>
    %cst_61 = arith.constant dense<0.000000e+00> : vector<16x256xf32>
    %55 = tpu.matmul %52, %54, %cst_61 {dimension_numbers = #tpu.dot_dimension_numbers<[1], [0], [0], [1], [0, 0, 1, 1], [], []>} : vector<16x640xbf16>, vector<640x256xbf16>, vector<16x256xf32> -> vector<16x256xf32>
    %c1_62 = arith.constant 1 : index
    %c0_63 = arith.constant 0 : index
    %c0_64 = arith.constant 0 : index
    %56 = vector.load %arg5[%c1_62, %c0_63, %c0_64] : memref<3x1x256xf32, #tpu.memory_space<vmem>>, vector<1x1x256xf32>
    %57 = vector.shape_cast %56 : vector<1x1x256xf32> to vector<1x256xf32>
    %58 = vector.broadcast %57 : vector<1x256xf32> to vector<16x256xf32>
    %59 = arith.addf %55, %58 : vector<16x256xf32>
    %60 = vector.extract_strided_slice %59 {offsets = [0, 0], sizes = [16, 128], strides = [1, 1]} : vector<16x256xf32> to vector<16x128xf32>
    %61 = vector.extract_strided_slice %59 {offsets = [0, 128], sizes = [16, 128], strides = [1, 1]} : vector<16x256xf32> to vector<16x128xf32>
    %62 = arith.negf %61 : vector<16x128xf32>
    %63 = math.exp %62 : vector<16x128xf32>
    %cst_65 = arith.constant 1.000000e+00 : f32
    %64 = vector.broadcast %cst_65 : f32 to vector<16x128xf32>
    %65 = arith.addf %64, %63 : vector<16x128xf32>
    %66 = arith.divf %64, %65 : vector<16x128xf32>
    %67 = arith.mulf %60, %66 : vector<16x128xf32>
    %68 = arith.addf %67, %39 : vector<16x128xf32>
    %cst_66 = arith.constant 0.707106769 : f32
    %69 = vector.broadcast %cst_66 : f32 to vector<16x128xf32>
    %70 = arith.mulf %68, %69 : vector<16x128xf32>
    %71 = arith.truncf %70 : vector<16x128xf32> to vector<16x128xbf16>
    %c2_67 = arith.constant 2 : index
    %c0_68 = arith.constant 0 : index
    %72 = vector.load %arg9[%c2_67, %c0_68] : memref<20x128xbf16, #tpu.memory_space<vmem>>, vector<16x128xbf16>
    tpu.vector_store %arg9[%c2_67, %c0_68], %71 {strides = array<i32>} : memref<20x128xbf16, #tpu.memory_space<vmem>>, vector<16x128xbf16>,
    %c0_69 = arith.constant 0 : index
    %c0_70 = arith.constant 0 : index
    %73 = vector.load %arg9[%c0_69, %c0_70] : memref<20x128xbf16, #tpu.memory_space<vmem>>, vector<16x128xbf16>
    %c0_71 = arith.constant 0 : index
    %c0_72 = arith.constant 0 : index
    %74 = vector.load %arg10[%c0_71, %c0_72] : memref<16x640xbf16, #tpu.memory_space<vmem>>, vector<16x128xbf16>
    tpu.vector_store %arg10[%c0_71, %c0_72], %73 {strides = array<i32>} : memref<16x640xbf16, #tpu.memory_space<vmem>>, vector<16x128xbf16>,
    %c1_73 = arith.constant 1 : index
    %c0_74 = arith.constant 0 : index
    %75 = vector.load %arg9[%c1_73, %c0_74] : memref<20x128xbf16, #tpu.memory_space<vmem>>, vector<16x128xbf16>
    %c0_75 = arith.constant 0 : index
    %c128_76 = arith.constant 128 : index
    %76 = vector.load %arg10[%c0_75, %c128_76] : memref<16x640xbf16, #tpu.memory_space<vmem>>, vector<16x128xbf16>
    tpu.vector_store %arg10[%c0_75, %c128_76], %75 {strides = array<i32>} : memref<16x640xbf16, #tpu.memory_space<vmem>>, vector<16x128xbf16>,
    %c2_77 = arith.constant 2 : index
    %c0_78 = arith.constant 0 : index
    %77 = vector.load %arg9[%c2_77, %c0_78] : memref<20x128xbf16, #tpu.memory_space<vmem>>, vector<16x128xbf16>
    %c0_79 = arith.constant 0 : index
    %c256_80 = arith.constant 256 : index
    %78 = vector.load %arg10[%c0_79, %c256_80] : memref<16x640xbf16, #tpu.memory_space<vmem>>, vector<16x128xbf16>
    tpu.vector_store %arg10[%c0_79, %c256_80], %77 {strides = array<i32>} : memref<16x640xbf16, #tpu.memory_space<vmem>>, vector<16x128xbf16>,
    %c3_81 = arith.constant 3 : index
    %c0_82 = arith.constant 0 : index
    %79 = vector.load %arg9[%c3_81, %c0_82] : memref<20x128xbf16, #tpu.memory_space<vmem>>, vector<16x128xbf16>
    %c0_83 = arith.constant 0 : index
    %c384_84 = arith.constant 384 : index
    %80 = vector.load %arg10[%c0_83, %c384_84] : memref<16x640xbf16, #tpu.memory_space<vmem>>, vector<16x128xbf16>
    tpu.vector_store %arg10[%c0_83, %c384_84], %79 {strides = array<i32>} : memref<16x640xbf16, #tpu.memory_space<vmem>>, vector<16x128xbf16>,
    %c4_85 = arith.constant 4 : index
    %c0_86 = arith.constant 0 : index
    %81 = vector.load %arg9[%c4_85, %c0_86] : memref<20x128xbf16, #tpu.memory_space<vmem>>, vector<16x128xbf16>
    %c0_87 = arith.constant 0 : index
    %c512_88 = arith.constant 512 : index
    %82 = vector.load %arg10[%c0_87, %c512_88] : memref<16x640xbf16, #tpu.memory_space<vmem>>, vector<16x128xbf16>
    tpu.vector_store %arg10[%c0_87, %c512_88], %81 {strides = array<i32>} : memref<16x640xbf16, #tpu.memory_space<vmem>>, vector<16x128xbf16>,
    %c0_89 = arith.constant 0 : index
    %c0_90 = arith.constant 0 : index
    %83 = vector.load %arg10[%c0_89, %c0_90] : memref<16x640xbf16, #tpu.memory_space<vmem>>, vector<16x640xbf16>
    %c2_91 = arith.constant 2 : index
    %c0_92 = arith.constant 0 : index
    %c0_93 = arith.constant 0 : index
    %84 = vector.load %arg4[%c2_91, %c0_92, %c0_93] : memref<3x640x256xbf16, #tpu.memory_space<vmem>>, vector<1x640x256xbf16>
    %85 = vector.shape_cast %84 : vector<1x640x256xbf16> to vector<640x256xbf16>
    %cst_94 = arith.constant dense<0.000000e+00> : vector<16x256xf32>
    %86 = tpu.matmul %83, %85, %cst_94 {dimension_numbers = #tpu.dot_dimension_numbers<[1], [0], [0], [1], [0, 0, 1, 1], [], []>} : vector<16x640xbf16>, vector<640x256xbf16>, vector<16x256xf32> -> vector<16x256xf32>
    %c2_95 = arith.constant 2 : index
    %c0_96 = arith.constant 0 : index
    %c0_97 = arith.constant 0 : index
    %87 = vector.load %arg5[%c2_95, %c0_96, %c0_97] : memref<3x1x256xf32, #tpu.memory_space<vmem>>, vector<1x1x256xf32>
    %88 = vector.shape_cast %87 : vector<1x1x256xf32> to vector<1x256xf32>
    %89 = vector.broadcast %88 : vector<1x256xf32> to vector<16x256xf32>
    %90 = arith.addf %86, %89 : vector<16x256xf32>
    %91 = vector.extract_strided_slice %90 {offsets = [0, 0], sizes = [16, 128], strides = [1, 1]} : vector<16x256xf32> to vector<16x128xf32>
    %92 = vector.extract_strided_slice %90 {offsets = [0, 128], sizes = [16, 128], strides = [1, 1]} : vector<16x256xf32> to vector<16x128xf32>
    %93 = arith.negf %92 : vector<16x128xf32>
    %94 = math.exp %93 : vector<16x128xf32>
    %cst_98 = arith.constant 1.000000e+00 : f32
    %95 = vector.broadcast %cst_98 : f32 to vector<16x128xf32>
    %96 = arith.addf %95, %94 : vector<16x128xf32>
    %97 = arith.divf %95, %96 : vector<16x128xf32>
    %98 = arith.mulf %91, %97 : vector<16x128xf32>
    %99 = arith.addf %98, %70 : vector<16x128xf32>
    %cst_99 = arith.constant 0.707106769 : f32
    %100 = vector.broadcast %cst_99 : f32 to vector<16x128xf32>
    %101 = arith.mulf %99, %100 : vector<16x128xf32>
    %cst_100 = arith.constant dense<0.000000e+00> : vector<16xf32>
    %102 = vector.multi_reduction <add>, %101, %cst_100 [1] : vector<16x128xf32> to vector<16xf32>
    %103 = vector.shape_cast %102 : vector<16xf32> to vector<16x1xf32>
    %cst_101 = arith.constant 3.125000e-02 : f32
    %104 = vector.broadcast %cst_101 : f32 to vector<16x1xf32>
    %105 = arith.mulf %103, %104 : vector<16x1xf32>
    %106 = vector.broadcast %105 : vector<16x1xf32> to vector<16x128xf32>
    %107 = arith.subf %101, %106 : vector<16x128xf32>
    %108 = tpu.iota {dimensions = array<i32: 1>} : vector<1x128xi32>
    %c32_i32 = arith.constant 32 : i32
    %109 = vector.broadcast %c32_i32 : i32 to vector<1x128xi32>
    %110 = arith.cmpi slt, %108, %109 : vector<1x128xi32>
    %111 = arith.extui %110 : vector<1x128xi1> to vector<1x128xi32>
    %112 = arith.sitofp %111 : vector<1x128xi32> to vector<1x128xf32>
    %113 = vector.broadcast %112 : vector<1x128xf32> to vector<16x128xf32>
    %114 = arith.mulf %107, %113 : vector<16x128xf32>
    %115 = arith.mulf %114, %114 : vector<16x128xf32>
    %cst_102 = arith.constant dense<0.000000e+00> : vector<16xf32>
    %116 = vector.multi_reduction <add>, %115, %cst_102 [1] : vector<16x128xf32> to vector<16xf32>
    %117 = vector.shape_cast %116 : vector<16xf32> to vector<16x1xf32>
    %cst_103 = arith.constant 3.125000e-02 : f32
    %118 = vector.broadcast %cst_103 : f32 to vector<16x1xf32>
    %119 = arith.mulf %117, %118 : vector<16x1xf32>
    %cst_104 = arith.constant 9.99999974E-6 : f32
    %120 = vector.broadcast %cst_104 : f32 to vector<16x1xf32>
    %121 = arith.addf %119, %120 : vector<16x1xf32>
    %122 = math.rsqrt %121 : vector<16x1xf32>
    %123 = vector.broadcast %122 : vector<16x1xf32> to vector<16x128xf32>
    %124 = arith.mulf %114, %123 : vector<16x128xf32>
    %c0_105 = arith.constant 0 : index
    %c0_106 = arith.constant 0 : index
    %125 = vector.load %arg6[%c0_105, %c0_106] : memref<1x128xf32, #tpu.memory_space<vmem>>, vector<1x128xf32>
    %126 = vector.broadcast %125 : vector<1x128xf32> to vector<16x128xf32>
    %127 = arith.mulf %124, %126 : vector<16x128xf32>
    %c0_107 = arith.constant 0 : index
    %c0_108 = arith.constant 0 : index
    %128 = vector.load %arg7[%c0_107, %c0_108] : memref<1x128xf32, #tpu.memory_space<vmem>>, vector<1x128xf32>
    %129 = vector.broadcast %128 : vector<1x128xf32> to vector<16x128xf32>
    %130 = arith.addf %127, %129 : vector<16x128xf32>
    %131 = vector.shape_cast %130 : vector<16x128xf32> to vector<1x16x128xf32>
    %c0_109 = arith.constant 0 : index
    %c0_110 = arith.constant 0 : index
    %c0_111 = arith.constant 0 : index
    %132 = vector.load %arg8[%c0_109, %c0_110, %c0_111] : memref<1x16x128xf32, #tpu.memory_space<vmem>>, vector<1x16x128xf32>
    tpu.vector_store %arg8[%c0_109, %c0_110, %c0_111], %131 {strides = array<i32>} : memref<1x16x128xf32, #tpu.memory_space<vmem>>, vector<1x16x128xf32>,
    return
  }
  func.func @transform_0(%arg0: i32) -> (i32, i32, i32) {
    %c0_i32 = arith.constant 0 : i32
    %c0_i32_0 = arith.constant 0 : i32
    %c0_i32_1 = arith.constant 0 : i32
    return %arg0, %c0_i32, %c0_i32_0 : i32, i32, i32
  }
  func.func @transform_1(%arg0: i32) -> (i32, i32) {
    %c0_i32 = arith.constant 0 : i32
    %c0_i32_0 = arith.constant 0 : i32
    %c0_i32_1 = arith.constant 0 : i32
    return %c0_i32, %c0_i32_0 : i32, i32
  }
  func.func @transform_2(%arg0: i32) -> (i32, i32) {
    %c0_i32 = arith.constant 0 : i32
    %c0_i32_0 = arith.constant 0 : i32
    %c0_i32_1 = arith.constant 0 : i32
    return %c0_i32, %c0_i32_0 : i32, i32
  }
  func.func @transform_3(%arg0: i32) -> (i32, i32, i32) {
    %c0_i32 = arith.constant 0 : i32
    %c0_i32_0 = arith.constant 0 : i32
    %c0_i32_1 = arith.constant 0 : i32
    %c0_i32_2 = arith.constant 0 : i32
    return %c0_i32, %c0_i32_0, %c0_i32_1 : i32, i32, i32
  }
  func.func @transform_4(%arg0: i32) -> (i32, i32, i32) {
    %c0_i32 = arith.constant 0 : i32
    %c0_i32_0 = arith.constant 0 : i32
    %c0_i32_1 = arith.constant 0 : i32
    %c0_i32_2 = arith.constant 0 : i32
    return %c0_i32, %c0_i32_0, %c0_i32_1 : i32, i32, i32
  }
  func.func @transform_5(%arg0: i32) -> (i32, i32) {
    %c0_i32 = arith.constant 0 : i32
    %c0_i32_0 = arith.constant 0 : i32
    %c0_i32_1 = arith.constant 0 : i32
    return %c0_i32, %c0_i32_0 : i32, i32
  }
  func.func @transform_6(%arg0: i32) -> (i32, i32) {
    %c0_i32 = arith.constant 0 : i32
    %c0_i32_0 = arith.constant 0 : i32
    %c0_i32_1 = arith.constant 0 : i32
    return %c0_i32, %c0_i32_0 : i32, i32
  }
  func.func @transform_7(%arg0: i32) -> (i32, i32, i32) {
    %c0_i32 = arith.constant 0 : i32
    %c0_i32_0 = arith.constant 0 : i32
    %c0_i32_1 = arith.constant 0 : i32
    return %arg0, %c0_i32, %c0_i32_0 : i32, i32, i32
  }
}

</mosaic_0001>

<bundles_post_ra>
// kernel: tpu_custom_call.1
= control target key start
LH: loop header
LB: loop body
LE: loop exit
PB: predicated region body
PF: predicated region fallthrough
CT: control target
= control target key end

     0   :  { %s4394_s0 = inlined_call_operand.hbm [shape: bf16[2,16,128], index: 0, kind: input, shape index: {}]   ;;  %s4395_s1 = inlined_call_operand.hbm [shape: bf16[128,128], index: 1, kind: input, shape index: {}]   ;;  %s4396_s2 = inlined_call_operand.vmem [shape: f32[1,128], index: 2, kind: input, shape index: {}]   ;;  %s4397_s3 = inlined_call_operand.hbm [shape: bf16[3,640,256], index: 3, kind: input, shape index: {}]   ;;  %s4398_s4 = inlined_call_operand.vmem [shape: f32[3,1,256], index: 4, kind: input, shape index: {}]   ;;  %s4399_s5 = inlined_call_operand.vmem [shape: f32[1,128], index: 5, kind: input, shape index: {}]   ;;  %s4400_s6 = inlined_call_operand.vmem [shape: f32[1,128], index: 6, kind: input, shape index: {}]   ;;  %s4401_s7 = inlined_call_operand.hbm [shape: f32[2,16,128], index: 7, kind: output, shape index: {}]  }
   0x1   :  { %4408 = sst [smem:[#allocation14_spill]] %s4395_s1 }
   0x2   :  { %12 = vsyncpa [#allocation5], 0 }
   0x3   :  { %14 = vsyncpa [#allocation5 + $0x1], 0 }
   0x4   :  { %15 = vsyncpa [#allocation8], 0 }
   0x5   :  { %16 = vsyncpa [#allocation6], 0 }
   0x6   :  { %18 = vsyncpa [#allocation6 + $0x1], 0  ;;  %s4038_s24 = smov 0   ;;  %s4040_s25 = smov 0  }
   0x7   :  { %s4042_s26 = smov 0   ;;  %s4044_s27 = smov 0  }
   0x8 LB: > { %s4059_s28 = sadd.s32 4294967295, %s3983_s27   ;;  %s3000_s29 = sadd.s32 4294967294, %s3983_s27   ;;  %s3983_s27 = sphi %s4044_s27, %s4438_s27   ;;  %s3979_s26 = sphi %s4042_s26, %s4437_s26   ;;  %s3975_s25 = sphi %s4040_s25, %s4436_s25   ;;  %s3971_s24 = sphi %s4038_s24, %s4435_s24  }
   0x9   : > { %p44_p0 = scmp.ne.s32.totalorder %s3975_s25, %s3971_s24  ;;  %p4403_p1 = scmp.eq.s32.totalorder %s4059_s28, 0 }
   0xa   : > { %p194_p2 = scmp.eq.s32.totalorder %s4059_s28, 1  ;;  %p200_p3 = scmp.eq.s32.totalorder %s3000_s29, 1 }
   0xb   : > { %p4068_p4 = por %p4403_p1, %p44_p0  ;;  %p3001_p5 = scmp.ge.s32.totalorder %s3983_s27, 1 }
   0xc   : > { %p4073_p6 = por %p200_p3, %p44_p0  ;;  %p207_p7 = scmp.lt.s32.totalorder %s3983_s27, 3 }
   0xd   : > { %s4409_s30 = scalar_select %p4068_p4, 1, 0 }
   0xe   : > { %s4410_s8 = scalar_select %p4073_p6, 1, 0 }
   0xf   : > { %p4078_p8 = pnand %p3001_p5, %p207_p7  ;;  %s3985_s10 = smov [#allocation7]  }
  0x10   : > { %s219_s11 = sshll.u32 %s3985_s10, 4  ;;  %s3986_s13 = smov [#allocation9]   ;;  %s220_s11 = int_to_ptr.vmem [resolvable:$true] %s219_s11 }
  0x11   : > { %s4411_s9 = scalar_select %p4078_p8, 1, 0 }
  0x12   : > { %p3355_p9 = pneg %p4078_p8  ;;  %s235_s14 = sshll.u32 %s3986_s13, 4  ;;  %s236_s14 = int_to_ptr.vmem [resolvable:$true] %s235_s14 }
  0x13   : > { %s3846_s15 = scalar_lea.vmem %s220_s11, 1024  ;;  %p3854_p5 = scmp.lt.s32.totalorder %s220_s11, %s220_s11 }
  0x14   : > { %p4087_p11 = pnand %p3355_p9, %p4403_p1  ;;  %p3847_p13 = scmp.ne.s32.totalorder %s220_s11, %s3846_s15 }
  0x15   : > { %p3855_p7 = scmp.lt.s32.totalorder %s3846_s15, %s3846_s15 }
  0x16   : > { %p3837_p12 = pneg %p4087_p11 }
  0x17   : > { %p3856_p10 = por %p3855_p7, %p3854_p5 }
  0x18   : > { %p3849_p0 = pnand %p3847_p13, %p3837_p12 }
  0x1a   : > { %p3850_p3 = pneg %p3849_p0 }
  0x1c   : > { %p3857_p9 = pnand %p3856_p10, %p3850_p3 }
  0x1e   : > { %3860 = shalt.err (!%p3857_p9)
}
  0x1f   : > { %s4402_s16 = smov 64   ;;  %s4404_s17 = smov 4  }
  0x20   : > { %s4413_s1 = sld [smem:[#allocation14_spill]]  ;;  %s3872_s20 = scalar_lea.vmem %s236_s14, 30720 }
  0x21   : > { %p3873_p13 = scmp.ne.s32.totalorder %s236_s14, %s3872_s20  ;;  %p3880_p10 = scmp.lt.s32.totalorder %s236_s14, %s236_s14 }
  0x22   : > { %p3881_p3 = scmp.lt.s32.totalorder %s3872_s20, %s3872_s20 }
  0x23   : > { %p3875_p0 = pnand %p3873_p13, %p3837_p12 }
  0x24   : > { %p3882_p7 = por %p3881_p3, %p3880_p10 }
  0x25   : > { %p3876_p5 = pneg %p3875_p0 }
  0x26   : > { %3358 = dma.hbm_to_vmem [thread:$0]  (!%p4087_p11), %s4413_s1, 1024, %s220_s11, [#allocation8], %s4402_s16, %s4402_s16, %s4404_s17  }
  0x27   : > { %p3883_p9 = pnand %p3882_p7, %p3876_p5 }
  0x29   : > { %3886 = shalt.err (!%p3883_p9)
}
  0x2a   : > { %s3989_s21 = smov 128   ;;  %s3990_s22 = smov 8  }
  0x2b   : > { %3361 = dma.hbm_to_vmem [thread:$0]  (!%p4087_p11), %s4397_s3, 30720, %s236_s14, [#allocation8], %s3989_s21, %s3989_s21, %s3990_s22  }
  0x2c   : > { %s4113_s10 = sadd.s32 1, %s3983_s27   ;;  %s31_s13 = sadd.s32 1, %s3979_s26 }
  0x2d   : > { %s28_s11 = ssub.s32 %s3983_s27, %s4113_s10  ;;  %p38_p13 = scmp.ne.s32.totalorder %s3979_s26, %s3975_s25 }
  0x2e   : > { %p29_p12 = scmp.eq.s32.totalorder %s28_s11, 0  ;;  %p39_p0 = scmp.eq.s32.totalorder %s3983_s27, 0 }
  0x2f   : > { %p4126_p10 = por %p194_p2, %p38_p13  ;;  %p3372_p3 = scmp.lt.s32.totalorder %s3983_s27, 2 }
  0x30   : > { %s4122_s15 = scalar_select %p29_p12, %s3979_s26, %s31_s13  }
  0x31   : > { %p40_p5 = por %p39_p0, %p38_p13  ;;  %s258_s12 = sand.u32 1, %s3979_s26  }
  0x32   : > { %s4414_s18 = scalar_select %p4126_p10, 1, 0 }
  0x33   : > { %s3005_s19 = sshll.u32 %s258_s12, 3  ;;  %s3306_s14 = sshll.u32 %s3983_s27, 7 }
  0x34   : > { %s4136_s22 = scalar_lea.hbm %s4394_s0, %s3306_s14  ;;  %s262_s23 = scalar_lea.vmem [#allocation4], %s3005_s19 }
  0x35   : > { %s269_s29 = sshll.u32 %s262_s23, 4  ;;  %p4140_p2 = pnand %p3372_p3, %p40_p5  ;;  %s4138_s29 = int_to_ptr.vmem [resolvable:$true] %s269_s29 }
  0x36   : > { %s4144_s13 = scalar_lea.sflag [#allocation5], %s258_s12  ;;  %s3887_s16 = scalar_lea.hbm %s4136_s22, 128 }
  0x37   : > { %p3888_p11 = scmp.ne.s32.totalorder %s4136_s22, %s3887_s16  ;;  %p3889_p7 = pneg %p4140_p2 }
  0x38   : > { %s3892_s19 = scalar_lea.hbm %s4394_s0, 256  ;;  %p3893_p13 = scmp.lt.s32.totalorder %s4136_s22, %s4394_s0 }
  0x39   : > { %p3890_p9 = pnand %p3889_p7, %p3888_p11  ;;  %p3894_p0 = scmp.lt.s32.totalorder %s3892_s19, %s3887_s16 }
  0x3b   : > { %p3891_p12 = pneg %p3890_p9  ;;  %p3895_p5 = por %p3894_p0, %p3893_p13 }
  0x3d   : > { %p3896_p3 = pnand %p3895_p5, %p3891_p12 }
  0x3f   : > { %3899 = shalt.err (!%p3896_p3)
}
  0x40   : > { %s3900_s12 = scalar_lea.vmem %s4138_s29, 128  ;;  %s3991_s17 = smov [#allocation4]  }
  0x41   : > { %p3901_p1 = scmp.ne.s32.totalorder %s4138_s29, %s3900_s12  ;;  %s3905_s1 = sshll.u32 %s3991_s17, 4  ;;  %s3906_s1 = int_to_ptr.vmem [resolvable:$false] %s3905_s1 }
  0x42   : > { %s3907_s14 = scalar_lea.vmem %s3906_s1, 256  ;;  %p3908_p9 = scmp.lt.s32.totalorder %s4138_s29, %s3906_s1 }
  0x43   : > { %p3903_p6 = pnand %p3901_p1, %p3889_p7  ;;  %p3909_p10 = scmp.lt.s32.totalorder %s3907_s14, %s3900_s12 }
  0x45   : > { %p3904_p11 = pneg %p3903_p6  ;;  %p3910_p4 = por %p3909_p10, %p3908_p9 }
  0x47   : > { %p3911_p8 = pnand %p3910_p4, %p3904_p11 }
  0x49   : > { %3914 = shalt.err (!%p3911_p8)
}
  0x4a   : > { %s4416_s16 = smov 4   ;;  %s4417_s20 = smov 64  }
  0x4b   : > { %3365 = dma.hbm_to_vmem [thread:$0]  (!%p4140_p2), %s4136_s22, 128, %s4138_s29, %s4144_s13, %s4417_s20, %s4417_s20, %s4416_s16  }
  0x4c   : > { %p4418_p1 = scmp.ne.s32.totalorder %s4411_s9, 0 }
  0x4d   : > { %s4171_s17 = sand.u32 (!%p4418_p1), 1, %s3975_s25   ;;  %p4419_p4 = scmp.ne.s32.totalorder (!%p4418_p1), %s4409_s30, 0 }
  0x4e   : > { %281 = sbr.rel (%p4418_p1) target bundleno = 1553 (0x611), region = 48  ;;  %s3009_s1 = sshll.u32 (!%p4418_p1), %s4171_s17, 3 }
  0x4f   : > { %s284_s19 = scalar_lea.sflag (!%p4418_p1), [#allocation5], %s4171_s17  ;;  %s4175_s21 = scalar_lea.vmem (!%p4418_p1), [#allocation4], %s3009_s1 }
  0x53   : > { %3958 = dma.done.wait (%p4419_p4), %s284_s19, 128  }
  0x54   : > { %3960 = vsyncadd (%p4419_p4), %s284_s19, 4294967168  ;;  %p4420_p6 = scmp.eq.s32.totalorder %s4059_s28, 0 }
  0x56   : > { %3962 = dma.done.wait (%p4420_p6), [#allocation8], 31744   ;;  %p4421_p8 = pmov %p4420_p6 }
  0x57   : > { %v3992_v0 = vmov 0.0   ;;  %vm3993_vm0 = vmmov 0   ;;  %v3419_v1 = vld [vmem:[#allocation7 + $0x38] sm:$0xff]   ;;  %v3420_v2 = vld [vmem:[#allocation7 + $0x30] sm:$0xff]   ;;  %v3421_v3 = vld [vmem:[#allocation7 + $0x28] sm:$0xff]   ;;  %v3994_v38 = vmov 0  }
  0x58   : > { %3964 = vsyncadd (%p4421_p8), [#allocation8], 4294935552  ;;  %3323 = vmatprep.subr.bf16.mxu0 %v3992_v0  ;;  %3339 = vmatprep.mubr.msk.bf16.mxu0 %vm3993_vm0, %v3992_v0  ;;  %v3422_v4 = vld [vmem:[#allocation7 + $0x20] sm:$0xff]   ;;  %v3428_v5 = vld [vmem:[#allocation9 + $0x74] ss:$8 sps:$4 sm:$0xff]   ;;  %vm456_vm1 = vcmask 1040384  }
  0x59   : > { %3324 = vmatpush3.bf16.msra.mxu0 %v3419_v1  ;;  %v3430_v6 = vld [vmem:[#allocation9 + $0x70] ss:$8 sps:$4 sm:$0xff]   ;;  %1110 = vmatprep.subr.bf16.mxu1 %v3428_v5  ;;  %v3434_v7 = vld [vmem:[#allocation9 + $0x64] ss:$8 sps:$4 sm:$0xff]   ;;  %v3436_v8 = vld [vmem:[#allocation9 + $0x60] ss:$8 sps:$4 sm:$0xff]  }
  0x5a   : > { %3325 = vmatprep.subr.bf16.mxu0 %v3992_v0  ;;  %1111 = vmatpush1.bf16.msra.mxu1 %v3430_v6  ;;  %v3423_v9 = vld [vmem:[#allocation7 + $0x18] sm:$0xff]   ;;  %v3446_v12 = vld [vmem:[#allocation9 + $0x44] ss:$8 sps:$4 sm:$0xff]   ;;  %v3424_v13 = vld [vmem:[#allocation7 + $0x10] sm:$0xff]   ;;  %447 = vst [vmem:[#allocation2] sm:$0xf] %v3994_v38 }
  0x5b   : > { %1112 = vmatprep.subr.bf16.mxu1 %v3434_v7  ;;  %v3440_v10 = vld [vmem:[#allocation9 + $0x54] ss:$8 sps:$4 sm:$0xff]   ;;  %v3442_v11 = vld [vmem:[#allocation9 + $0x50] ss:$8 sps:$4 sm:$0xff]   ;;  %v3448_v14 = vld [vmem:[#allocation9 + $0x40] ss:$8 sps:$4 sm:$0xff]  }
  0x5c   : > { %v3452_v15 = vld [vmem:[#allocation9 + $0x34] ss:$8 sps:$4 sm:$0xff]   ;;  %v3425_v16 = vld [vmem:[#allocation7 + $0x8] sm:$0xff]   ;;  %v3426_v17 = vld [vmem:[#allocation7] sm:$0xff]   ;;  %448 = vst [vmem:[#allocation2 + $0x4] sm:$0xf] %v3994_v38 }
  0x5d   : > { %3326 = vmatpush3.bf16.msra.mxu0 %v3420_v2  ;;  %v3454_v18 = vld [vmem:[#allocation9 + $0x30] ss:$8 sps:$4 sm:$0xff]   ;;  %v3433_v19 = vld [vmem:[#allocation9 + $0x174] ss:$8 sps:$4 sm:$0xff]   ;;  %v3458_v20 = vld [vmem:[#allocation9 + $0x24] ss:$8 sps:$4 sm:$0xff]  }
  0x5e   : > { %3327 = vmatprep.subr.bf16.mxu0 %v3992_v0  ;;  %1113 = vmatpush1.bf16.msra.mxu1 %v3436_v8  ;;  %v3460_v21 = vld [vmem:[#allocation9 + $0x20] ss:$8 sps:$4 sm:$0xff]   ;;  %v3427_v22 = vld [vmem:[%s4175_s21] sm:$0xff]   ;;  %v3439_v25 = vld [vmem:[#allocation9 + $0x164] ss:$8 sps:$4 sm:$0xff]   ;;  %vm457_vm2 = vcmask 1044484  }
  0x5f   : > { %1114 = vmatprep.subr.bf16.mxu1 %v3440_v10  ;;  %v3464_v23 = vld [vmem:[#allocation9 + $0x14] ss:$8 sps:$4 sm:$0xff]   ;;  %v3431_v24 = vld [vmem:[#allocation9 + $0x170] ss:$8 sps:$4 sm:$0xff]   ;;  %v3437_v26 = vld [vmem:[#allocation9 + $0x160] ss:$8 sps:$4 sm:$0xff]  }
  0x60   : > { %v3445_v27 = vld [vmem:[#allocation9 + $0x154] ss:$8 sps:$4 sm:$0xff]   ;;  %v3443_v28 = vld [vmem:[#allocation9 + $0x150] ss:$8 sps:$4 sm:$0xff]   ;;  %v3451_v29 = vld [vmem:[#allocation9 + $0x144] ss:$8 sps:$4 sm:$0xff]  }
  0x61   : > { %3328 = vmatpush3.bf16.msra.mxu0 %v3421_v3  ;;  %v3449_v30 = vld [vmem:[#allocation9 + $0x140] ss:$8 sps:$4 sm:$0xff]   ;;  %v3457_v31 = vld [vmem:[#allocation9 + $0x134] ss:$8 sps:$4 sm:$0xff]   ;;  %v3455_v32 = vld [vmem:[#allocation9 + $0x130] ss:$8 sps:$4 sm:$0xff]  }
  0x62   : > { %3329 = vmatprep.subr.bf16.mxu0 %v3992_v0  ;;  %1115 = vmatpush1.bf16.msra.mxu1 %v3442_v11  ;;  %v3463_v33 = vld [vmem:[#allocation9 + $0x124] ss:$8 sps:$4 sm:$0xff]   ;;  %v3461_v34 = vld [vmem:[#allocation9 + $0x120] ss:$8 sps:$4 sm:$0xff]   ;;  %v3466_v35 = vld [vmem:[#allocation9 + $0x10] ss:$8 sps:$4 sm:$0xff]  }
  0x63   : > { %1116 = vmatprep.subr.bf16.mxu1 %v3446_v12  ;;  %v3469_v36 = vld [vmem:[#allocation9 + $0x114] ss:$8 sps:$4 sm:$0xff]   ;;  %v3467_v37 = vld [vmem:[#allocation9 + $0x110] ss:$8 sps:$4 sm:$0xff]   ;;  %449 = vst [vmem:[#allocation2 + $0x8] sm:$0x3] %v3994_v38  ;;  %vm4209_vm3 = vmor %vm456_vm1, %vm457_vm2 }
  0x64   : > { %v3470_v39 = vld [vmem:[#allocation9 + $0x4] ss:$8 sps:$4 sm:$0xff]   ;;  %v3472_v40 = vld [vmem:[#allocation9] ss:$8 sps:$4 sm:$0xff]   ;;  %v3476_v43 = vld [vmem:[#allocation9 + $0xf4] ss:$8 sps:$4 sm:$0xff]  }
  0x65   : > { %3330 = vmatpush3.bf16.msra.mxu0 %v3422_v4  ;;  %v3475_v41 = vld [vmem:[#allocation9 + $0x104] ss:$8 sps:$4 sm:$0xff]   ;;  %v3473_v42 = vld [vmem:[#allocation9 + $0x100] ss:$8 sps:$4 sm:$0xff]   ;;  %v3478_v44 = vld [vmem:[#allocation9 + $0xf0] ss:$8 sps:$4 sm:$0xff]  }
  0x66   : > { %3331 = vmatprep.subr.bf16.mxu0 %v3992_v0  ;;  %1117 = vmatpush1.bf16.msra.mxu1 %v3448_v14  ;;  %v3481_v45 = vld [vmem:[#allocation9 + $0x1f4] ss:$8 sps:$4 sm:$0xff]   ;;  %v3479_v46 = vld [vmem:[#allocation9 + $0x1f0] ss:$8 sps:$4 sm:$0xff]   ;;  %v3482_v47 = vld [vmem:[#allocation9 + $0xe4] ss:$8 sps:$4 sm:$0xff]  }
  0x67   : > { %1118 = vmatprep.subr.bf16.mxu1 %v3452_v15  ;;  %v3484_v48 = vld [vmem:[#allocation9 + $0xe0] ss:$8 sps:$4 sm:$0xff]   ;;  %v3487_v49 = vld [vmem:[#allocation9 + $0x1e4] ss:$8 sps:$4 sm:$0xff]   ;;  %v3488_v51 = vld [vmem:[#allocation9 + $0xd4] ss:$8 sps:$4 sm:$0xff]  }
  0x68   : > { %v3485_v50 = vld [vmem:[#allocation9 + $0x1e0] ss:$8 sps:$4 sm:$0xff]   ;;  %v3490_v52 = vld [vmem:[#allocation9 + $0xd0] ss:$8 sps:$4 sm:$0xff]   ;;  %v3493_v53 = vld [vmem:[#allocation9 + $0x1d4] ss:$8 sps:$4 sm:$0xff]  }
  0x69   : > { %3332 = vmatpush3.bf16.msra.mxu0 %v3423_v9  ;;  %v3491_v54 = vld [vmem:[#allocation9 + $0x1d0] ss:$8 sps:$4 sm:$0xff]   ;;  %v3494_v55 = vld [vmem:[#allocation9 + $0xc4] ss:$8 sps:$4 sm:$0xff]   ;;  %v3496_v56 = vld [vmem:[#allocation9 + $0xc0] ss:$8 sps:$4 sm:$0xff]  }
  0x6a   : > { %3333 = vmatprep.subr.bf16.mxu0 %v3992_v0  ;;  %1119 = vmatpush1.bf16.msra.mxu1 %v3454_v18  ;;  %v3499_v57 = vld [vmem:[#allocation9 + $0x1c4] ss:$8 sps:$4 sm:$0xff]   ;;  %v3497_v58 = vld [vmem:[#allocation9 + $0x1c0] ss:$8 sps:$4 sm:$0xff]   ;;  %v3500_v59 = vld [vmem:[#allocation9 + $0xb4] ss:$8 sps:$4 sm:$0xff]  }
  0x6b   : > { %1120 = vmatprep.subr.bf16.mxu1 %v3458_v20  ;;  %v3502_v60 = vld [vmem:[#allocation9 + $0xb0] ss:$8 sps:$4 sm:$0xff]   ;;  %v3505_v61 = vld [vmem:[#allocation9 + $0x1b4] ss:$8 sps:$4 sm:$0xff]   ;;  %v3506_v63 = vld [vmem:[#allocation9 + $0xa4] ss:$8 sps:$4 sm:$0xff]  }
  0x6c   : > { %v3503_v62 = vld [vmem:[#allocation9 + $0x1b0] ss:$8 sps:$4 sm:$0xff]   ;;  %v3508_v1 = vld [vmem:[#allocation9 + $0xa0] ss:$8 sps:$4 sm:$0xff]   ;;  %v3511_v3 = vld [vmem:[#allocation9 + $0x1a4] ss:$8 sps:$4 sm:$0xff]  }
  0x6d   : > { %3334 = vmatpush3.bf16.msra.mxu0 %v3424_v13  ;;  %v3509_v2 = vld [vmem:[#allocation9 + $0x1a0] ss:$8 sps:$4 sm:$0xff]   ;;  %v3512_v4 = vld [vmem:[#allocation9 + $0x94] ss:$8 sps:$4 sm:$0xff]   ;;  %v3514_v5 = vld [vmem:[#allocation9 + $0x90] ss:$8 sps:$4 sm:$0xff]  }
  0x6e   : > { %3335 = vmatprep.subr.bf16.mxu0 %v3992_v0  ;;  %1121 = vmatpush1.bf16.msra.mxu1 %v3460_v21  ;;  %v3517_v6 = vld [vmem:[#allocation9 + $0x194] ss:$8 sps:$4 sm:$0xff]   ;;  %v3515_v7 = vld [vmem:[#allocation9 + $0x190] ss:$8 sps:$4 sm:$0xff]   ;;  %v3518_v8 = vld [vmem:[#allocation9 + $0x84] ss:$8 sps:$4 sm:$0xff]  }
  0x6f   : > { %1122 = vmatprep.subr.bf16.mxu1 %v3464_v23  ;;  %v3523_v9 = vld [vmem:[#allocation9 + $0x184] ss:$8 sps:$4 sm:$0xff]   ;;  %v3520_v10 = vld [vmem:[#allocation9 + $0x80] ss:$8 sps:$4 sm:$0xff]   ;;  %v3530_v12 = vld [vmem:[#allocation9 + $0x274] ss:$8 sps:$4 sm:$0xff]  }
  0x70   : > { %v3521_v11 = vld [vmem:[#allocation9 + $0x180] ss:$8 sps:$4 sm:$0xff]   ;;  %v3013_v13 = vld [vmem:[%s4396_s2] ss:$0 sm:$0xff]  ;;  %vm514_vm4 = vcmask 1042432   ;;  %vm515_vm5 = vcmask 1046532  }
  0x71   : > { %3336 = vmatpush3.bf16.msra.mxu0 %v3425_v16  ;;  %vm572_vm6 = vcmask 1041408   ;;  %vm477_vm7 = vsmask.f32 3328  ;;  %vm478_vm8 = vsmask.f32 7440  ;;  %vm573_vm11 = vcmask 1045508   ;;  %vm4223_vm13 = vmor %vm514_vm4, %vm515_vm5 }
  0x72   : > { %3337 = vmatprep.subr.bf16.mxu0 %v3992_v0  ;;  %1123 = vmatpush1.bf16.msra.mxu1 %v3466_v35  ;;  %vm531_vm9 = vsmask.f32 2304  ;;  %vm532_vm10 = vsmask.f32 6416  ;;  %vm4217_vm12 = vmor %vm477_vm7, %vm478_vm8  ;;  %s3012_s20 = sshll.u32 %s4171_s17, 4  ;;  %s3313_s21 = sshll.u32 %s4059_s28, 8 }
  0x73   : > { %1124 = vmatprep.subr.bf16.mxu1 %v3470_v39  ;;  %vm4231_vm14 = vmor %vm572_vm6, %vm573_vm11  ;;  %s325_s30 = scalar_lea.vmem [#allocation10], %s3012_s20  ;;  %s4349_s11 = scalar_lea.hbm %s4401_s7, %s3313_s21 }
  0x74   : > { %vm4241_vm15 = vmor %vm531_vm9, %vm532_vm10  ;;  %s2908_s9 = sshll.u32 %s325_s30, 4  ;;  %s2895_s13 = scalar_lea.sflag [#allocation6], %s4171_s17  ;;  %s4351_s9 = int_to_ptr.vmem [resolvable:$true] %s2908_s9 }
  0x75   : > { %3338 = vmatpush3.bf16.msra.mxu0 %v3426_v17  ;;  %s3915_s23 = scalar_lea.vmem %s4351_s9, 256  ;;  %p4432_p2 = scmp.ne.s32.totalorder %s4414_s18, 0 }
  0x76   : > { %1153 = vmatprep.subr.bf16.mxu0 %v3433_v19  ;;  %1125 = vmatpush1.bf16.msra.mxu1 %v3472_v40  ;;  %p3916_p10 = scmp.ne.s32.totalorder %s4351_s9, %s3915_s23  ;;  %s3995_s28 = smov [#allocation10]  }
  0x77   : > { %1126 = vmatprep.subr.bf16.mxu1 %v3476_v43  ;;  %s3919_s12 = sshll.u32 %s3995_s28, 4  ;;  %s3920_s12 = int_to_ptr.vmem [resolvable:$false] %s3919_s12 }
  0x78   : > { %3340 = vmatmul.mubr.bf16.vlgmr.msra.gmra.mxu0 %v3427_v22  ;;  %p3917_p7 = pnand %p3916_p10, %p4432_p2  ;;  %s3921_s14 = scalar_lea.vmem %s3920_s12, 512 }
  0x79   : > { %1154 = vmatpush1.bf16.msra.mxu0 %v3431_v24  ;;  %p3922_p13 = scmp.lt.s32.totalorder %s4351_s9, %s3920_s12  ;;  %p3923_p0 = scmp.lt.s32.totalorder %s3921_s14, %s3915_s23 }
  0x7a   : > { %1155 = vmatprep.subr.bf16.mxu0 %v3439_v25  ;;  %1127 = vmatpush2.bf16.msra.mxu1 %v3478_v44  ;;  %p3918_p12 = pneg %p3917_p7 }
  0x7b   : > { %1128 = vmatprep.subr.bf16.mxu1 %v3482_v47  ;;  %p3924_p5 = por %p3923_p0, %p3922_p13 }
  0x7d   : > { %1156 = vmatpush1.bf16.msra.mxu0 %v3437_v26  ;;  %p3925_p3 = pnand %p3924_p5, %p3918_p12 }
  0x7e   : > { %1157 = vmatprep.subr.bf16.mxu0 %v3445_v27  ;;  %1129 = vmatpush2.bf16.msra.mxu1 %v3484_v48 }
  0x7f   : > { %1130 = vmatprep.subr.bf16.mxu1 %v3488_v51 }
  0x81   : > { %1158 = vmatpush1.bf16.msra.mxu0 %v3443_v28 }
  0x82   : > { %1159 = vmatprep.subr.bf16.mxu0 %v3451_v29  ;;  %1131 = vmatpush2.bf16.msra.mxu1 %v3490_v52 }
  0x83   : > { %1132 = vmatprep.subr.bf16.mxu1 %v3494_v55 }
  0x85   : > { %1160 = vmatpush1.bf16.msra.mxu0 %v3449_v30 }
  0x86   : > { %1161 = vmatprep.subr.bf16.mxu0 %v3457_v31  ;;  %1133 = vmatpush2.bf16.msra.mxu1 %v3496_v56 }
  0x87   : > { %1134 = vmatprep.subr.bf16.mxu1 %v3500_v59 }
  0x89   : > { %1162 = vmatpush1.bf16.msra.mxu0 %v3455_v32 }
  0x8a   : > { %1163 = vmatprep.subr.bf16.mxu0 %v3463_v33  ;;  %1135 = vmatpush2.bf16.msra.mxu1 %v3502_v60 }
  0x8b   : > { %1136 = vmatprep.subr.bf16.mxu1 %v3506_v63 }
  0x8d   : > { %1164 = vmatpush1.bf16.msra.mxu0 %v3461_v34 }
  0x8e   : > { %1165 = vmatprep.subr.bf16.mxu0 %v3469_v36  ;;  %1137 = vmatpush2.bf16.msra.mxu1 %v3508_v1 }
  0x8f   : > { %1138 = vmatprep.subr.bf16.mxu1 %v3512_v4 }
  0x91   : > { %1166 = vmatpush1.bf16.msra.mxu0 %v3467_v37 }
  0x92   : > { %1167 = vmatprep.subr.bf16.mxu0 %v3475_v41  ;;  %1139 = vmatpush2.bf16.msra.mxu1 %v3514_v5 }
  0x93   : > { %1140 = vmatprep.subr.bf16.mxu1 %v3518_v8 }
  0x95   : > { %1168 = vmatpush1.bf16.msra.mxu0 %v3473_v42 }
  0x96   : > { %1169 = vmatprep.subr.bf16.mxu0 %v3481_v45  ;;  %1141 = vmatpush2.bf16.msra.mxu1 %v3520_v10 }
  0x97   : > { %1196 = vmatprep.subr.bf16.mxu1 %v3530_v12 }
  0x99   : > { %1170 = vmatpush2.bf16.msra.mxu0 %v3479_v46 }
  0x9a   : > { %1171 = vmatprep.subr.bf16.mxu0 %v3487_v49 }
  0x9d   : > { %1172 = vmatpush2.bf16.msra.mxu0 %v3485_v50 }
  0x9e   : > { %1173 = vmatprep.subr.bf16.mxu0 %v3493_v53 }
  0xa1   : > { %1174 = vmatpush2.bf16.msra.mxu0 %v3491_v54 }
  0xa2   : > { %1175 = vmatprep.subr.bf16.mxu0 %v3499_v57 }
  0xa5   : > { %1176 = vmatpush2.bf16.msra.mxu0 %v3497_v58 }
  0xa6   : > { %1177 = vmatprep.subr.bf16.mxu0 %v3505_v61 }
  0xa9   : > { %1178 = vmatpush2.bf16.msra.mxu0 %v3503_v62 }
  0xaa   : > { %1179 = vmatprep.subr.bf16.mxu0 %v3511_v3 }
  0xad   : > { %1180 = vmatpush2.bf16.msra.mxu0 %v3509_v2 }
  0xae   : > { %1181 = vmatprep.subr.bf16.mxu0 %v3517_v6 }
  0xb1   : > { %1182 = vmatpush2.bf16.msra.mxu0 %v3515_v7 }
  0xb2   : > { %1183 = vmatprep.subr.bf16.mxu0 %v3523_v9 }
  0xb5   : > { %1184 = vmatpush2.bf16.msra.mxu0 %v3521_v11  ;;  %v3790_v11 = vld [vmem:[#allocation9 + $0x754] ss:$8 sps:$4 sm:$0xff]  }
 0x138   : > { %v440_v14 = vpop.f32.mrf.mxu0 }
 0x139   : > { %v4201_v15 = vadd.f32 %v3013_v13, %v440_v14 }
 0x13a   : > { %v3341_v16 = vpop.f32.mrf.mxu0 }
 0x13b   : > { %v3307_v17 = vpack.c.bf16 %v4201_v15, %v4201_v15 }
 0x13c   : > { %v443_v18 = vpop.f32.mrf.mxu0 }
 0x13d   : > { %v459_v19 = vrot.slane %v3307_v17, 7  ;;  %v4205_v20 = vadd.f32 %v3013_v13, %v443_v18 }
 0x13e   : > { %v3342_v21 = vpop.f32.mrf.mxu0 }
 0x13f   : > { %467 = vst [vmem:[#allocation2] sm:$0xe] %v459_v19  ;;  %v3308_v22 = vpack.c.bf16 %v4205_v20, %v4205_v20  ;;  %v460_v24 = vrot.slane %v459_v19, 4 }
 0x141   : > { %v461_v25 = vrot.slane %v3308_v22, 7  ;;  %v3788_v22 = vld [vmem:[#allocation9 + $0x750] ss:$8 sps:$4 sm:$0xff]  }
 0x143   : > { %v462_v26 = vsel %vm4209_vm3, %v460_v24, %v461_v25  ;;  %v463_v27 = vrot.slane %v461_v25, 4 }
 0x144   : > { %468 = vst [vmem:[#allocation2 + $0x4] sm:$0xf] %v462_v26 }
 0x145   : > { %469 = vst [vmem:[#allocation2 + $0x8] sm:$0x1] %v463_v27 }
 0x146   : > { %v470_v28 = vld [vmem:[#allocation2] sm:$0xf] }
 0x147   : > { %v474_v29 = vld [vmem:[#allocation2] sm:$0xf]  ;;  %472 = vst [vmem:[#allocation3] sm:$0xf] %v470_v28 }
 0x148   : > { %v481_v30 = vshrl.u32 %v474_v29, 16  ;;  %v484_v31 = vshll.u32 %v474_v29, 16  ;;  %v508_v32 = vld [vmem:[#allocation2] sm:$0xe] }
 0x149   : > { %v528_v33 = vld [vmem:[#allocation2] sm:$0xe]  ;;  %v3025_v39 = vrot.slane %v508_v32, 9 }
 0x14a   : > { %v535_v34 = vshrl.u32 %v528_v33, 16  ;;  %v538_v35 = vshll.u32 %v528_v33, 16  ;;  %v483_v36 = vrot.slane %v481_v30, 4  ;;  %v486_v37 = vrot.slane %v484_v31, 5  ;;  %v566_v42 = vld [vmem:[#allocation2] sm:$0xc] }
 0x14b   : > { %v471_v44 = vld [vmem:[#allocation2 + $0x4] sm:$0xf]  ;;  %v3026_v52 = vrot.slane %v566_v42, 10 }
 0x14c   : > { %v537_v40 = vrot.slane %v535_v34, 5  ;;  %v540_v41 = vrot.slane %v538_v35, 6  ;;  %v487_v43 = vor.u32 %v486_v37, %v483_v36  ;;  %v475_v45 = vld [vmem:[#allocation2 + $0x4] sm:$0xf]  ;;  %v476_v48 = vld [vmem:[#allocation2 + $0x8] sm:$0x1] }
 0x14d   : > { %v509_v46 = vld [vmem:[#allocation2 + $0x4] sm:$0xf]  ;;  %v490_v49 = vshll.u32 %v475_v45, 16  ;;  %v494_v50 = vshrl.u32 %v475_v45, 16  ;;  %v510_v51 = vld [vmem:[#allocation2 + $0x8] sm:$0x1] }
 0x14e   : > { %v541_v47 = vor.u32 %v540_v41, %v537_v40  ;;  %473 = vst [vmem:[#allocation3 + $0x14] sm:$0xf] %v471_v44  ;;  %v500_v53 = vshll.u32 %v476_v48, 16  ;;  %v519_v54 = vrot.slane %v509_v46, 5  ;;  %v529_v55 = vld [vmem:[#allocation2 + $0x4] sm:$0xf] }
 0x14f   : > { %v488_v57 = vrot.slane %v487_v43, 4  ;;  %v492_v58 = vrot.slane %v490_v49, 5  ;;  %v496_v59 = vrot.slane %v494_v50, 4  ;;  %v522_v60 = vrot.slane %v510_v51, 5  ;;  %v530_v61 = vld [vmem:[#allocation2 + $0x8] sm:$0x3] }
 0x150   : > { %v544_v62 = vshrl.u32 %v529_v55, 16  ;;  %v542_v63 = vrot.slane %v541_v47, 4  ;;  %v521_v1 = vrot.slane %v519_v54, 4  ;;  %v547_v2 = vshll.u32 %v529_v55, 16  ;;  %v567_v4 = vld [vmem:[#allocation2 + $0x4] sm:$0xf] }
 0x151   : > { %v554_v3 = vshrl.u32 %v530_v61, 16  ;;  %v557_v7 = vshll.u32 %v530_v61, 16  ;;  %v568_v8 = vld [vmem:[#allocation2 + $0x8] sm:$0x3]  ;;  %v577_v9 = vrot.slane %v567_v4, 6  ;;  %v493_v10 = vsel %vm4217_vm12, %v488_v57, %v492_v58 }
 0x152   : > { %v546_v6 = vrot.slane %v544_v62, 5  ;;  %v549_v12 = vrot.slane %v547_v2, 6  ;;  %v580_v14 = vrot.slane %v568_v8, 6  ;;  %v497_v16 = vor.u32 %v496_v59, %v492_v58  ;;  %506 = vst [vmem:[#allocation3 + $0x4] sm:$0xf] %v493_v10 }
 0x153   : > { %v556_v13 = vrot.slane %v554_v3, 5  ;;  %v559_v17 = vrot.slane %v557_v7, 6  ;;  %v579_v18 = vrot.slane %v577_v9, 4  ;;  %v520_v19 = vsel %vm4223_vm13, %v3025_v39, %v519_v54  ;;  %v3528_v35 = vld [vmem:[#allocation9 + $0x270] ss:$8 sps:$4 sm:$0xff]  }
 0x154   : > { %v523_v21 = vsel %vm4223_vm13, %v521_v1, %v522_v60  ;;  %v502_v24 = vrot.slane %v500_v53, 5  ;;  %v550_v25 = vor.u32 %v549_v12, %v546_v6  ;;  %v498_v26 = vrot.slane %v497_v16, 4  ;;  %526 = vst [vmem:[#allocation3 + $0x8] sm:$0xf] %v520_v19  ;;  %v3534_v40 = vld [vmem:[#allocation9 + $0x264] ss:$8 sps:$4 sm:$0xff]  }
 0x155   : > { %527 = vst [vmem:[#allocation3 + $0x1c] sm:$0xf] %v523_v21  ;;  %v578_v27 = vsel %vm4231_vm14, %v3026_v52, %v577_v9  ;;  %v560_v28 = vor.u32 %v559_v17, %v556_v13  ;;  %v581_v29 = vsel %vm4231_vm14, %v579_v18, %v580_v14  ;;  %v3532_v43 = vld [vmem:[#allocation9 + $0x260] ss:$8 sps:$4 sm:$0xff]   ;;  %v3537_v44 = vld [vmem:[#allocation9 + $0x254] ss:$8 sps:$4 sm:$0xff]  }
 0x156   : > { %584 = vst [vmem:[#allocation3 + $0x10] sm:$0xf] %v578_v27  ;;  %v552_v30 = vrot.slane %v550_v25, 4  ;;  %v503_v31 = vsel %vm4217_vm12, %v498_v26, %v502_v24  ;;  %v551_v32 = vsel %vm4241_vm15, %v542_v63, %v550_v25  ;;  %585 = vst [vmem:[#allocation3 + $0x24] sm:$0xf] %v581_v29 }
 0x157   : > { %507 = vst [vmem:[#allocation3 + $0x18] sm:$0xf] %v503_v31  ;;  %564 = vst [vmem:[#allocation3 + $0xc] sm:$0xf] %v551_v32  ;;  %v3535_v45 = vld [vmem:[#allocation9 + $0x250] ss:$8 sps:$4 sm:$0xff]  }
 0x158   : > { %v561_v33 = vsel %vm4241_vm15, %v552_v30, %v560_v28  ;;  %v3540_v46 = vld [vmem:[#allocation9 + $0x244] ss:$8 sps:$4 sm:$0xff]   ;;  %v3538_v47 = vld [vmem:[#allocation9 + $0x240] ss:$8 sps:$4 sm:$0xff]   ;;  %v3543_v48 = vld [vmem:[#allocation9 + $0x234] ss:$8 sps:$4 sm:$0xff]  }
 0x159   : > { %565 = vst [vmem:[#allocation3 + $0x20] sm:$0xf] %v561_v33  ;;  %v586_v34 = vld [vmem:[#allocation3] sm:$0xff]  ;;  %v3541_v49 = vld [vmem:[#allocation9 + $0x230] ss:$8 sps:$4 sm:$0xff]  }
 0x15a   : > { %v3546_v50 = vld [vmem:[#allocation9 + $0x224] ss:$8 sps:$4 sm:$0xff]   ;;  %v3544_v51 = vld [vmem:[#allocation9 + $0x220] ss:$8 sps:$4 sm:$0xff]   ;;  %v3549_v52 = vld [vmem:[#allocation9 + $0x214] ss:$8 sps:$4 sm:$0xff]  }
 0x15b   : > { %v3547_v53 = vld [vmem:[#allocation9 + $0x210] ss:$8 sps:$4 sm:$0xff]   ;;  %v3552_v54 = vld [vmem:[#allocation9 + $0x204] ss:$8 sps:$4 sm:$0xff]   ;;  %v3550_v55 = vld [vmem:[#allocation9 + $0x200] ss:$8 sps:$4 sm:$0xff]  }
 0x15c   : > { %v3531_v42 = vld [vmem:[#allocation3 + $0x8] ss:$20 sps:$4 sm:$0xff]   ;;  %v3556_v58 = vld [vmem:[#allocation9 + $0x2f4] ss:$8 sps:$4 sm:$0xff]   ;;  %v3560_v63 = vld [vmem:[#allocation9 + $0x2e0] ss:$8 sps:$4 sm:$0xff]  }
 0x15d   : > { %v3553_v57 = vld [vmem:[#allocation3 + $0x10] ss:$20 sps:$4 sm:$0xff]   ;;  %v3559_v60 = vld [vmem:[#allocation9 + $0x3f4] ss:$8 sps:$4 sm:$0xff]   ;;  %1904 = vmatprep.subr.bf16.mxu0 %v3556_v58  ;;  %v3563_v2 = vld [vmem:[#allocation9 + $0x3e0] ss:$8 sps:$4 sm:$0xff]  }
 0x15e   : > { %v589_v36 = vld [vmem:[#allocation3 + $0x14] sm:$0xff]  ;;  %v3554_v59 = vld [vmem:[#allocation9 + $0x2f0] ss:$8 sps:$4 sm:$0xff]   ;;  %v3562_v62 = vld [vmem:[#allocation9 + $0x2e4] ss:$8 sps:$4 sm:$0xff]  }
 0x15f   : > { %v3524_v37 = vld [vmem:[#allocation3 + $0x4] ss:$20 sps:$4 sm:$0xff]   ;;  %v3027_v39 = vcombine.low %v586_v34, %v589_v36  ;;  %v3557_v61 = vld [vmem:[#allocation9 + $0x3f0] ss:$8 sps:$4 sm:$0xff]   ;;  %v3568_v3 = vld [vmem:[#allocation9 + $0x2d4] ss:$8 sps:$4 sm:$0xff]  }
 0x160   : > { %1142 = vmatprep.mubr.bf16.mxu1 %v3524_v37  ;;  %v3526_v41 = vld [vmem:[#allocation3 + $0xc] ss:$20 sps:$4 sm:$0xff]   ;;  %v3565_v1 = vld [vmem:[#allocation9 + $0x3e4] ss:$8 sps:$4 sm:$0xff]   ;;  %v3566_v4 = vld [vmem:[#allocation9 + $0x2d0] ss:$8 sps:$4 sm:$0xff]  }
 0x161   : > { %1143 = vmatmul.mubr.bf16.vlgmr.msra.gmra.mxu1 %v3027_v39  ;;  %1185 = vmatprep.mubr.bf16.mxu0 %v3526_v41  ;;  %v3571_v6 = vld [vmem:[#allocation9 + $0x3d4] ss:$8 sps:$4 sm:$0xff]   ;;  %v3569_v7 = vld [vmem:[#allocation9 + $0x3d0] ss:$8 sps:$4 sm:$0xff]   ;;  %v3574_v8 = vld [vmem:[#allocation9 + $0x2c4] ss:$8 sps:$4 sm:$0xff]  }
 0x162   : > { %1197 = vmatpush1.bf16.msra.mxu1 %v3528_v35  ;;  %1186 = vmatmul.mubr.bf16.vlgmr.msra.gmra.mxu0 %v3531_v42  ;;  %v3572_v9 = vld [vmem:[#allocation9 + $0x2c0] ss:$8 sps:$4 sm:$0xff]   ;;  %v3577_v10 = vld [vmem:[#allocation9 + $0x3c4] ss:$8 sps:$4 sm:$0xff]   ;;  %v3580_v13 = vld [vmem:[#allocation9 + $0x2b4] ss:$8 sps:$4 sm:$0xff]  }
 0x163   : > { %1198 = vmatprep.subr.bf16.mxu1 %v3534_v40  ;;  %1228 = vmatprep.mubr.bf16.mxu1 %v3994_v38  ;;  %v3575_v12 = vld [vmem:[#allocation9 + $0x3c0] ss:$8 sps:$4 sm:$0xff]   ;;  %v3578_v14 = vld [vmem:[#allocation9 + $0x2b0] ss:$8 sps:$4 sm:$0xff]   ;;  %v3583_v16 = vld [vmem:[#allocation9 + $0x3b4] ss:$8 sps:$4 sm:$0xff]  }
 0x164   : > { %1905 = vmatpush1.bf16.msra.mxu0 %v3554_v59  ;;  %v3581_v17 = vld [vmem:[#allocation9 + $0x3b0] ss:$8 sps:$4 sm:$0xff]   ;;  %v3586_v18 = vld [vmem:[#allocation9 + $0x2a4] ss:$8 sps:$4 sm:$0xff]   ;;  %v3584_v19 = vld [vmem:[#allocation9 + $0x2a0] ss:$8 sps:$4 sm:$0xff]  }
 0x165   : > { %1906 = vmatprep.subr.bf16.mxu0 %v3562_v62  ;;  %v3589_v21 = vld [vmem:[#allocation9 + $0x3a4] ss:$8 sps:$4 sm:$0xff]   ;;  %v3587_v24 = vld [vmem:[#allocation9 + $0x3a0] ss:$8 sps:$4 sm:$0xff]   ;;  %v3592_v25 = vld [vmem:[#allocation9 + $0x294] ss:$8 sps:$4 sm:$0xff]  }
 0x166   : > { %1199 = vmatpush1.bf16.msra.mxu1 %v3532_v43  ;;  %v3590_v26 = vld [vmem:[#allocation9 + $0x290] ss:$8 sps:$4 sm:$0xff]   ;;  %v3595_v27 = vld [vmem:[#allocation9 + $0x394] ss:$8 sps:$4 sm:$0xff]   ;;  %v3598_v29 = vld [vmem:[#allocation9 + $0x284] ss:$8 sps:$4 sm:$0xff]  }
 0x167   : > { %1200 = vmatprep.subr.bf16.mxu1 %v3537_v44  ;;  %v3593_v28 = vld [vmem:[#allocation9 + $0x390] ss:$8 sps:$4 sm:$0xff]   ;;  %v3596_v30 = vld [vmem:[#allocation9 + $0x280] ss:$8 sps:$4 sm:$0xff]   ;;  %v3601_v31 = vld [vmem:[#allocation9 + $0x384] ss:$8 sps:$4 sm:$0xff]  }
 0x168   : > { %1907 = vmatpush1.bf16.msra.mxu0 %v3560_v63  ;;  %v3599_v32 = vld [vmem:[#allocation9 + $0x380] ss:$8 sps:$4 sm:$0xff]   ;;  %v3604_v33 = vld [vmem:[#allocation9 + $0x374] ss:$8 sps:$4 sm:$0xff]   ;;  %v3602_v34 = vld [vmem:[#allocation9 + $0x370] ss:$8 sps:$4 sm:$0xff]  }
 0x169   : > { %1908 = vmatprep.subr.bf16.mxu0 %v3568_v3  ;;  %v3607_v35 = vld [vmem:[#allocation9 + $0x474] ss:$8 sps:$4 sm:$0xff]   ;;  %v3605_v36 = vld [vmem:[#allocation9 + $0x470] ss:$8 sps:$4 sm:$0xff]   ;;  %v3610_v37 = vld [vmem:[#allocation9 + $0x364] ss:$8 sps:$4 sm:$0xff]  }
 0x16a   : > { %1201 = vmatpush1.bf16.msra.mxu1 %v3535_v45  ;;  %v3608_v39 = vld [vmem:[#allocation9 + $0x360] ss:$8 sps:$4 sm:$0xff]   ;;  %v3613_v40 = vld [vmem:[#allocation9 + $0x464] ss:$8 sps:$4 sm:$0xff]   ;;  %v3616_v42 = vld [vmem:[#allocation9 + $0x354] ss:$8 sps:$4 sm:$0xff]  }
 0x16b   : > { %1202 = vmatprep.subr.bf16.mxu1 %v3540_v46  ;;  %v3611_v41 = vld [vmem:[#allocation9 + $0x460] ss:$8 sps:$4 sm:$0xff]   ;;  %v3614_v43 = vld [vmem:[#allocation9 + $0x350] ss:$8 sps:$4 sm:$0xff]   ;;  %v3619_v44 = vld [vmem:[#allocation9 + $0x454] ss:$8 sps:$4 sm:$0xff]  }
 0x16c   : > { %1909 = vmatpush1.bf16.msra.mxu0 %v3566_v4  ;;  %v3617_v45 = vld [vmem:[#allocation9 + $0x450] ss:$8 sps:$4 sm:$0xff]   ;;  %v3622_v46 = vld [vmem:[#allocation9 + $0x344] ss:$8 sps:$4 sm:$0xff]   ;;  %v3635_v58 = vld [vmem:[#allocation9 + $0x420] ss:$8 sps:$4 sm:$0xff]  }
 0x16d   : > { %1910 = vmatprep.subr.bf16.mxu0 %v3574_v8  ;;  %v3640_v59 = vld [vmem:[#allocation9 + $0x314] ss:$8 sps:$4 sm:$0xff]   ;;  %v3641_v62 = vld [vmem:[#allocation9 + $0x410] ss:$8 sps:$4 sm:$0xff]   ;;  %v3646_v63 = vld [vmem:[#allocation9 + $0x304] ss:$8 sps:$4 sm:$0xff]  }
 0x16e   : > { %1203 = vmatpush1.bf16.msra.mxu1 %v3538_v47  ;;  %v3625_v47 = vld [vmem:[#allocation9 + $0x444] ss:$8 sps:$4 sm:$0xff]   ;;  %v3647_v3 = vld [vmem:[#allocation9 + $0x400] ss:$8 sps:$4 sm:$0xff]   ;;  %v3656_v4 = vld [vmem:[#allocation9 + $0x4f4] ss:$8 sps:$4 sm:$0xff]  }
 0x16f   : > { %1204 = vmatprep.subr.bf16.mxu1 %v3543_v48  ;;  %v3620_v48 = vld [vmem:[#allocation9 + $0x340] ss:$8 sps:$4 sm:$0xff]  }
 0x170   : > { %1911 = vmatpush1.bf16.msra.mxu0 %v3572_v9 }
 0x171   : > { %1912 = vmatprep.subr.bf16.mxu0 %v3580_v13 }
 0x172   : > { %1205 = vmatpush1.bf16.msra.mxu1 %v3541_v49  ;;  %v3623_v49 = vld [vmem:[#allocation9 + $0x440] ss:$8 sps:$4 sm:$0xff]  }
 0x173   : > { %1206 = vmatprep.subr.bf16.mxu1 %v3546_v50  ;;  %v3628_v50 = vld [vmem:[#allocation9 + $0x334] ss:$8 sps:$4 sm:$0xff]  }
 0x174   : > { %1913 = vmatpush1.bf16.msra.mxu0 %v3578_v14 }
 0x175   : > { %1914 = vmatprep.subr.bf16.mxu0 %v3586_v18 }
 0x176   : > { %1207 = vmatpush1.bf16.msra.mxu1 %v3544_v51  ;;  %v3631_v51 = vld [vmem:[#allocation9 + $0x434] ss:$8 sps:$4 sm:$0xff]  }
 0x177   : > { %1208 = vmatprep.subr.bf16.mxu1 %v3549_v52  ;;  %v3626_v52 = vld [vmem:[#allocation9 + $0x330] ss:$8 sps:$4 sm:$0xff]  }
 0x178   : > { %1915 = vmatpush1.bf16.msra.mxu0 %v3584_v19 }
 0x179   : > { %1916 = vmatprep.subr.bf16.mxu0 %v3592_v25 }
 0x17a   : > { %1209 = vmatpush1.bf16.msra.mxu1 %v3547_v53  ;;  %v3629_v53 = vld [vmem:[#allocation9 + $0x430] ss:$8 sps:$4 sm:$0xff]  }
 0x17b   : > { %1210 = vmatprep.subr.bf16.mxu1 %v3552_v54  ;;  %v3634_v54 = vld [vmem:[#allocation9 + $0x324] ss:$8 sps:$4 sm:$0xff]  }
 0x17c   : > { %1917 = vmatpush1.bf16.msra.mxu0 %v3590_v26 }
 0x17d   : > { %1918 = vmatprep.subr.bf16.mxu0 %v3598_v29 }
 0x17e   : > { %1211 = vmatpush1.bf16.msra.mxu1 %v3550_v55  ;;  %v3637_v55 = vld [vmem:[#allocation9 + $0x424] ss:$8 sps:$4 sm:$0xff]  }
 0x17f   : > { %1947 = vmatprep.subr.bf16.mxu1 %v3559_v60  ;;  %v3643_v60 = vld [vmem:[#allocation9 + $0x414] ss:$8 sps:$4 sm:$0xff]  }
 0x180   : > { %1919 = vmatpush1.bf16.msra.mxu0 %v3596_v30 }
 0x181   : > { %1229 = vmatmul.mubr.bf16.vlgmr.msra.gmra.mxu1 %v3553_v57  ;;  %1920 = vmatprep.subr.bf16.mxu0 %v3604_v33  ;;  %v3632_v57 = vld [vmem:[#allocation9 + $0x320] ss:$8 sps:$4 sm:$0xff]  }
 0x182   : > { %1948 = vmatpush1.bf16.msra.mxu1 %v3557_v61  ;;  %v3638_v61 = vld [vmem:[#allocation9 + $0x310] ss:$8 sps:$4 sm:$0xff]  }
 0x183   : > { %1949 = vmatprep.subr.bf16.mxu1 %v3565_v1  ;;  %v3649_v1 = vld [vmem:[#allocation9 + $0x404] ss:$8 sps:$4 sm:$0xff]  }
 0x184   : > { %1921 = vmatpush2.bf16.msra.mxu0 %v3602_v34 }
 0x185   : > { %1922 = vmatprep.subr.bf16.mxu0 %v3610_v37 }
 0x186   : > { %1950 = vmatpush1.bf16.msra.mxu1 %v3563_v2  ;;  %v3644_v2 = vld [vmem:[#allocation9 + $0x300] ss:$8 sps:$4 sm:$0xff]  }
 0x187   : > { %1951 = vmatprep.subr.bf16.mxu1 %v3571_v6  ;;  %v674_v6 = vlaneseq }
 0x188   : > { %1923 = vmatpush2.bf16.msra.mxu0 %v3608_v39 }
 0x189   : > { %1924 = vmatprep.subr.bf16.mxu0 %v3616_v42  ;;  %v675_v8 = vshrl.u32 %v674_v6, 7 }
 0x18a   : > { %1952 = vmatpush1.bf16.msra.mxu1 %v3569_v7 }
 0x18b   : > { %1953 = vmatprep.subr.bf16.mxu1 %v3577_v10  ;;  %v4257_v9 = vsub.s32 1, %v675_v8  ;;  %v4263_v37 = vsub.s32 0, %v675_v8 }
 0x18c   : > { %1925 = vmatpush2.bf16.msra.mxu0 %v3614_v43 }
 0x18d   : > { %1926 = vmatprep.subr.bf16.mxu0 %v3622_v46 }
 0x18e   : > { %1954 = vmatpush1.bf16.msra.mxu1 %v3575_v12  ;;  %v672_v12 = vld [vmem:[%s4398_s4] sm:$0x3] }
 0x18f   : > { %1955 = vmatprep.subr.bf16.mxu1 %v3583_v16  ;;  %v681_v14 = vrot.slane %v672_v12, %v4257_v9 }
 0x190   : > { %1927 = vmatpush2.bf16.msra.mxu0 %v3620_v48 }
 0x191   : > { %1928 = vmatprep.subr.bf16.mxu0 %v3628_v50 }
 0x192   : > { %1956 = vmatpush1.bf16.msra.mxu1 %v3581_v17 }
 0x193   : > { %1957 = vmatprep.subr.bf16.mxu1 %v3589_v21 }
 0x194   : > { %1929 = vmatpush2.bf16.msra.mxu0 %v3626_v52 }
 0x195   : > { %1930 = vmatprep.subr.bf16.mxu0 %v3634_v54 }
 0x196   : > { %1958 = vmatpush1.bf16.msra.mxu1 %v3587_v24 }
 0x197   : > { %1959 = vmatprep.subr.bf16.mxu1 %v3595_v27 }
 0x198   : > { %1931 = vmatpush2.bf16.msra.mxu0 %v3632_v57 }
 0x199   : > { %1932 = vmatprep.subr.bf16.mxu0 %v3640_v59 }
 0x19a   : > { %1960 = vmatpush1.bf16.msra.mxu1 %v3593_v28 }
 0x19b   : > { %1961 = vmatprep.subr.bf16.mxu1 %v3601_v31 }
 0x19c   : > { %1933 = vmatpush2.bf16.msra.mxu0 %v3638_v61 }
 0x19d   : > { %1934 = vmatprep.subr.bf16.mxu0 %v3646_v63 }
 0x19e   : > { %1962 = vmatpush1.bf16.msra.mxu1 %v3599_v32 }
 0x19f   : > { %1963 = vmatprep.subr.bf16.mxu1 %v3607_v35 }
 0x1a0   : > { %1935 = vmatpush2.bf16.msra.mxu0 %v3644_v2 }
 0x1a1   : > { %1990 = vmatprep.subr.bf16.mxu0 %v3656_v4 }
 0x1a2   : > { %1964 = vmatpush2.bf16.msra.mxu1 %v3605_v36 }
 0x1a3   : > { %1965 = vmatprep.subr.bf16.mxu1 %v3613_v40 }
 0x1a6   : > { %1966 = vmatpush2.bf16.msra.mxu1 %v3611_v41  ;;  %v677_v41 = vrot.slane %v672_v12, %v4263_v37 }
 0x1a7   : > { %1967 = vmatprep.subr.bf16.mxu1 %v3619_v44 }
 0x1aa   : > { %1968 = vmatpush2.bf16.msra.mxu1 %v3617_v45 }
 0x1ab   : > { %1969 = vmatprep.subr.bf16.mxu1 %v3625_v47 }
 0x1ae   : > { %1970 = vmatpush2.bf16.msra.mxu1 %v3623_v49 }
 0x1af   : > { %1971 = vmatprep.subr.bf16.mxu1 %v3631_v51 }
 0x1b2   : > { %1972 = vmatpush2.bf16.msra.mxu1 %v3629_v53 }
 0x1b3   : > { %1973 = vmatprep.subr.bf16.mxu1 %v3637_v55 }
 0x1b6   : > { %1974 = vmatpush2.bf16.msra.mxu1 %v3635_v58 }
 0x1b7   : > { %1975 = vmatprep.subr.bf16.mxu1 %v3643_v60 }
 0x1ba   : > { %1976 = vmatpush2.bf16.msra.mxu1 %v3641_v62 }
 0x1bb   : > { %1977 = vmatprep.subr.bf16.mxu1 %v3649_v1 }
 0x1be   : > { %1978 = vmatpush2.bf16.msra.mxu1 %v3647_v3 }
 0x221   : > { %v1144_v7 = vpop.f32.mrf.mxu1 }
 0x222   : > { %v1187_v13 = vpop.f32.mrf.mxu0  ;;  %v1145_v43 = vadd.f32 %v1144_v7, %v677_v41 }
 0x223   : > { %v1146_v10 = vpop.f32.mrf.mxu1 }
 0x224   : > { %v1189_v17 = vpop.f32.mrf.mxu0  ;;  %v1147_v18 = vadd.f32 %v1146_v10, %v681_v14  ;;  %v1188_v44 = vadd.f32 %v1187_v13, %v1145_v43 }
 0x225   : > { %v1148_v16 = vpop.f32.mrf.mxu1 }
 0x226   : > { %v1191_v21 = vpop.f32.mrf.mxu0  ;;  %v1190_v25 = vadd.f32 %v1189_v17, %v1147_v18  ;;  %v1149_v45 = vadd.f32 %v1148_v16, %v677_v41 }
 0x227   : > { %v1150_v19 = vpop.f32.mrf.mxu1 }
 0x228   : > { %v1151_v26 = vadd.f32 %v1150_v19, %v681_v14  ;;  %v1193_v29 = vpop.f32.mrf.mxu0  ;;  %v1192_v48 = vadd.f32 %v1191_v21, %v1149_v45 }
 0x22a   : > { %v1194_v31 = vadd.f32 %v1193_v29, %v1151_v26 }
 0x241   : > { %v1230_v24 = vpop.f32.mrf.mxu1 }
 0x242   : > { %v1231_v46 = vadd.f32 %v1230_v24, %v1188_v44 }
 0x243   : > { %v1232_v27 = vpop.f32.mrf.mxu1 }
 0x244   : > { %v1233_v28 = vadd.f32 %v1232_v27, %v1190_v25 }
 0x245   : > { %v1234_v30 = vpop.f32.mrf.mxu1 }
 0x246   : > { %v3112_v32 = vmul.f32 -1.442695, %v1233_v28  ;;  %v1235_v51 = vadd.f32 %v1234_v30, %v1192_v48 }
 0x247   : > { %v1236_v33 = vpop.f32.mrf.mxu1 }
 0x248   : > { %3807 = vpow2.f32 %v3112_v32  ;;  %v1237_v34 = vadd.f32 %v1236_v33, %v1194_v31 }
 0x24a   : > { %v3113_v35 = vmul.f32 -1.442695, %v1237_v34 }
 0x24c   : > { %3809 = vpow2.f32 %v3113_v35 }
 0x255   : > { %v3808_v36 = vpop.eup %3807 }
 0x256   : > { %v1245_v39 = vadd.f32 1.0, %v3808_v36 }
 0x258   : > { %3811 = vrcp.f32 %v1245_v39 }
 0x259   : > { %v3810_v40 = vpop.eup %3809 }
 0x25a   : > { %v1246_v42 = vadd.f32 1.0, %v3810_v40 }
 0x25c   : > { %3813 = vrcp.f32 %v1246_v42 }
 0x265   : > { %v3812_v47 = vpop.eup %3811 }
 0x266   : > { %v1251_v49 = vmul.f32 %v3812_v47, %v1231_v46 }
 0x268   : > { %v1253_v50 = vadd.f32 %v1251_v49, %v4201_v15 }
 0x269   : > { %v3814_v52 = vpop.eup %3813 }
 0x26a   : > { %v4267_v53 = vmul.f32 0.70710677, %v1253_v50  ;;  %v1252_v54 = vmul.f32 %v3814_v52, %v1235_v51 }
 0x26c   : > { %v3309_v55 = vpack.c.bf16 %v4267_v53, %v4267_v53  ;;  %v1254_v57 = vadd.f32 %v1252_v54, %v4205_v20 }
 0x26e   : > { %v1263_v58 = vrot.slane %v3309_v55, 7  ;;  %v4272_v59 = vmul.f32 0.70710677, %v1254_v57 }
 0x270   : > { %1271 = vst [vmem:[#allocation2] sm:$0xe] %v1263_v58  ;;  %v3310_v60 = vpack.c.bf16 %v4272_v59, %v4272_v59  ;;  %v1264_v61 = vrot.slane %v1263_v58, 4 }
 0x272   : > { %v1265_v62 = vrot.slane %v3310_v60, 7 }
 0x274   : > { %v1266_v15 = vsel %vm4209_vm3, %v1264_v61, %v1265_v62  ;;  %v1267_v63 = vrot.slane %v1265_v62, 4 }
 0x275   : > { %1272 = vst [vmem:[#allocation2 + $0x4] sm:$0xf] %v1266_v15 }
 0x276   : > { %1273 = vst [vmem:[#allocation2 + $0x8] sm:$0x1] %v1267_v63 }
 0x277   : > { %v1274_v1 = vld [vmem:[#allocation2] sm:$0xf] }
 0x278   : > { %v1278_v2 = vld [vmem:[#allocation2] sm:$0xf]  ;;  %1276 = vst [vmem:[#allocation3] sm:$0xf] %v1274_v1 }
 0x279   : > { %v1282_v3 = vshrl.u32 %v1278_v2, 16  ;;  %v1285_v20 = vshll.u32 %v1278_v2, 16  ;;  %v1309_v4 = vld [vmem:[#allocation2] sm:$0xe] }
 0x27a   : > { %v1326_v7 = vld [vmem:[#allocation2] sm:$0xe]  ;;  %v3116_v14 = vrot.slane %v1309_v4, 9 }
 0x27b   : > { %v1330_v8 = vshrl.u32 %v1326_v7, 16  ;;  %v1333_v10 = vshll.u32 %v1326_v7, 16  ;;  %v1284_v12 = vrot.slane %v1282_v3, 4  ;;  %v1287_v13 = vrot.slane %v1285_v20, 5  ;;  %v1361_v18 = vld [vmem:[#allocation2] sm:$0xc] }
 0x27c   : > { %v1275_v19 = vld [vmem:[#allocation2 + $0x4] sm:$0xf]  ;;  %v3117_v35 = vrot.slane %v1361_v18, 10 }
 0x27d   : > { %v1332_v16 = vrot.slane %v1330_v8, 5  ;;  %v1335_v17 = vrot.slane %v1333_v10, 6  ;;  %v1279_v21 = vld [vmem:[#allocation2 + $0x4] sm:$0xf]  ;;  %v1288_v24 = vor.u32 %v1287_v13, %v1284_v12  ;;  %1277 = vst [vmem:[#allocation3 + $0x14] sm:$0xf] %v1275_v19 }
 0x27e   : > { %v1310_v25 = vld [vmem:[#allocation2 + $0x4] sm:$0xf]  ;;  %v1280_v26 = vld [vmem:[#allocation2 + $0x8] sm:$0x1]  ;;  %v1291_v27 = vshll.u32 %v1279_v21, 16  ;;  %v1295_v28 = vshrl.u32 %v1279_v21, 16 }
 0x27f   : > { %v1311_v29 = vld [vmem:[#allocation2 + $0x8] sm:$0x1]  ;;  %v1336_v30 = vor.u32 %v1335_v17, %v1332_v16  ;;  %v1289_v31 = vrot.slane %v1288_v24, 4  ;;  %v1317_v32 = vrot.slane %v1310_v25, 5  ;;  %v1327_v34 = vld [vmem:[#allocation2 + $0x4] sm:$0xf] }
 0x280   : > { %v1320_v33 = vrot.slane %v1311_v29, 5  ;;  %v1293_v36 = vrot.slane %v1291_v27, 5  ;;  %v1297_v39 = vrot.slane %v1295_v28, 4  ;;  %v1301_v40 = vshll.u32 %v1280_v26, 16  ;;  %v1328_v41 = vld [vmem:[#allocation2 + $0x8] sm:$0x3] }
 0x281   : > { %v1339_v42 = vshrl.u32 %v1327_v34, 16  ;;  %v1318_v43 = vsel %vm4223_vm13, %v3116_v14, %v1317_v32  ;;  %v1319_v44 = vrot.slane %v1317_v32, 4  ;;  %v1337_v45 = vrot.slane %v1336_v30, 4  ;;  %v1362_v47 = vld [vmem:[#allocation2 + $0x4] sm:$0xf] }
 0x282   : > { %v1342_v46 = vshll.u32 %v1327_v34, 16  ;;  %v1294_v48 = vsel %vm4217_vm12, %v1289_v31, %v1293_v36  ;;  %v1298_v49 = vor.u32 %v1297_v39, %v1293_v36  ;;  %1324 = vst [vmem:[#allocation3 + $0x8] sm:$0xf] %v1318_v43  ;;  %v1349_v51 = vshrl.u32 %v1328_v41, 16  ;;  %v1363_v52 = vld [vmem:[#allocation2 + $0x8] sm:$0x3] }
 0x283   : > { %v1341_v50 = vrot.slane %v1339_v42, 5  ;;  %1307 = vst [vmem:[#allocation3 + $0x4] sm:$0xf] %v1294_v48  ;;  %v1321_v54 = vsel %vm4223_vm13, %v1319_v44, %v1320_v33  ;;  %v1352_v57 = vshll.u32 %v1328_v41, 16  ;;  %v1369_v58 = vrot.slane %v1362_v47, 6 }
 0x284   : > { %v1344_v55 = vrot.slane %v1342_v46, 6  ;;  %v1299_v60 = vrot.slane %v1298_v49, 4  ;;  %v1303_v61 = vrot.slane %v1301_v40, 5  ;;  %1325 = vst [vmem:[#allocation3 + $0x1c] sm:$0xf] %v1321_v54  ;;  %v1351_v62 = vrot.slane %v1349_v51, 5 }
 0x285   : > { %v1372_v15 = vrot.slane %v1363_v52, 6  ;;  %v1354_v1 = vrot.slane %v1352_v57, 6  ;;  %v1370_v2 = vsel %vm4231_vm14, %v3117_v35, %v1369_v58  ;;  %v1371_v3 = vrot.slane %v1369_v58, 4  ;;  %v3654_v13 = vld [vmem:[#allocation9 + $0x4f0] ss:$8 sps:$4 sm:$0xff]  }
 0x286   : > { %v1345_v63 = vor.u32 %v1344_v55, %v1341_v50  ;;  %v1304_v20 = vsel %vm4217_vm12, %v1299_v60, %v1303_v61  ;;  %1376 = vst [vmem:[#allocation3 + $0x10] sm:$0xf] %v1370_v2  ;;  %v3660_v19 = vld [vmem:[#allocation9 + $0x4e4] ss:$8 sps:$4 sm:$0xff]   ;;  %v3658_v25 = vld [vmem:[#allocation9 + $0x4e0] ss:$8 sps:$4 sm:$0xff]  }
 0x287   : > { %1308 = vst [vmem:[#allocation3 + $0x18] sm:$0xf] %v1304_v20  ;;  %v1355_v8 = vor.u32 %v1354_v1, %v1351_v62  ;;  %v1373_v10 = vsel %vm4231_vm14, %v1371_v3, %v1372_v15  ;;  %v3663_v26 = vld [vmem:[#allocation9 + $0x4d4] ss:$8 sps:$4 sm:$0xff]   ;;  %v3661_v27 = vld [vmem:[#allocation9 + $0x4d0] ss:$8 sps:$4 sm:$0xff]  }
 0x288   : > { %v1346_v4 = vsel %vm4241_vm15, %v1337_v45, %v1345_v63  ;;  %v1347_v7 = vrot.slane %v1345_v63, 4  ;;  %1377 = vst [vmem:[#allocation3 + $0x24] sm:$0xf] %v1373_v10  ;;  %v3666_v28 = vld [vmem:[#allocation9 + $0x4c4] ss:$8 sps:$4 sm:$0xff]  }
 0x289   : > { %1359 = vst [vmem:[#allocation3 + $0xc] sm:$0xf] %v1346_v4  ;;  %v3664_v29 = vld [vmem:[#allocation9 + $0x4c0] ss:$8 sps:$4 sm:$0xff]   ;;  %v3669_v30 = vld [vmem:[#allocation9 + $0x4b4] ss:$8 sps:$4 sm:$0xff]  }
 0x28a   : > { %v1356_v12 = vsel %vm4241_vm15, %v1347_v7, %v1355_v8  ;;  %v1378_v14 = vld [vmem:[#allocation3] sm:$0xff]  ;;  %v3667_v31 = vld [vmem:[#allocation9 + $0x4b0] ss:$8 sps:$4 sm:$0xff]   ;;  %v3675_v34 = vld [vmem:[#allocation9 + $0x494] ss:$8 sps:$4 sm:$0xff]  }
 0x28b   : > { %1360 = vst [vmem:[#allocation3 + $0x20] sm:$0xf] %v1356_v12  ;;  %v3657_v24 = vld [vmem:[#allocation3 + $0x8] ss:$20 sps:$4 sm:$0xff]   ;;  %v3670_v33 = vld [vmem:[#allocation9 + $0x4a0] ss:$8 sps:$4 sm:$0xff]  }
 0x28c   : > { %v3672_v32 = vld [vmem:[#allocation9 + $0x4a4] ss:$8 sps:$4 sm:$0xff]   ;;  %v3673_v35 = vld [vmem:[#allocation9 + $0x490] ss:$8 sps:$4 sm:$0xff]   ;;  %v3676_v39 = vld [vmem:[#allocation9 + $0x480] ss:$8 sps:$4 sm:$0xff]  }
 0x28d   : > { %v3678_v36 = vld [vmem:[#allocation9 + $0x484] ss:$8 sps:$4 sm:$0xff]   ;;  %v3682_v41 = vld [vmem:[#allocation9 + $0x574] ss:$8 sps:$4 sm:$0xff]   ;;  %v3680_v42 = vld [vmem:[#allocation9 + $0x570] ss:$8 sps:$4 sm:$0xff]  }
 0x28e   : > { %v1381_v16 = vld [vmem:[#allocation3 + $0x14] sm:$0xff]  ;;  %2698 = vmatprep.subr.bf16.mxu1 %v3682_v41  ;;  %v3683_v44 = vld [vmem:[#allocation9 + $0x670] ss:$8 sps:$4 sm:$0xff]   ;;  %v3688_v45 = vld [vmem:[#allocation9 + $0x564] ss:$8 sps:$4 sm:$0xff]  }
 0x28f   : > { %v3650_v17 = vld [vmem:[#allocation3 + $0x4] ss:$20 sps:$4 sm:$0xff]   ;;  %v3119_v18 = vcombine.low %v1378_v14, %v1381_v16  ;;  %v3685_v43 = vld [vmem:[#allocation9 + $0x674] ss:$8 sps:$4 sm:$0xff]   ;;  %v3692_v50 = vld [vmem:[#allocation9 + $0x550] ss:$8 sps:$4 sm:$0xff]  }
 0x290   : > { %1936 = vmatprep.mubr.bf16.mxu0 %v3650_v17  ;;  %v3679_v40 = vld [vmem:[#allocation3 + $0x10] ss:$20 sps:$4 sm:$0xff]   ;;  %v3686_v46 = vld [vmem:[#allocation9 + $0x560] ss:$8 sps:$4 sm:$0xff]   ;;  %v3694_v49 = vld [vmem:[#allocation9 + $0x554] ss:$8 sps:$4 sm:$0xff]  }
 0x291   : > { %1937 = vmatmul.mubr.bf16.vlgmr.msra.gmra.mxu0 %v3119_v18  ;;  %v3691_v47 = vld [vmem:[#allocation9 + $0x664] ss:$8 sps:$4 sm:$0xff]   ;;  %v3689_v48 = vld [vmem:[#allocation9 + $0x660] ss:$8 sps:$4 sm:$0xff]   ;;  %v3697_v51 = vld [vmem:[#allocation9 + $0x654] ss:$8 sps:$4 sm:$0xff]  }
 0x292   : > { %v3652_v21 = vld [vmem:[#allocation3 + $0xc] ss:$20 sps:$4 sm:$0xff]   ;;  %1991 = vmatpush1.bf16.msra.mxu0 %v3654_v13  ;;  %2022 = vmatprep.mubr.bf16.mxu0 %v3994_v38  ;;  %v3695_v52 = vld [vmem:[#allocation9 + $0x650] ss:$8 sps:$4 sm:$0xff]   ;;  %v3700_v54 = vld [vmem:[#allocation9 + $0x544] ss:$8 sps:$4 sm:$0xff]  }
 0x293   : > { %1979 = vmatprep.mubr.bf16.mxu1 %v3652_v21  ;;  %1992 = vmatprep.subr.bf16.mxu0 %v3660_v19  ;;  %v3698_v55 = vld [vmem:[#allocation9 + $0x540] ss:$8 sps:$4 sm:$0xff]   ;;  %v3703_v57 = vld [vmem:[#allocation9 + $0x644] ss:$8 sps:$4 sm:$0xff]   ;;  %v3706_v60 = vld [vmem:[#allocation9 + $0x534] ss:$8 sps:$4 sm:$0xff]  }
 0x294   : > { %1980 = vmatmul.mubr.bf16.vlgmr.msra.gmra.mxu1 %v3657_v24  ;;  %v3701_v58 = vld [vmem:[#allocation9 + $0x640] ss:$8 sps:$4 sm:$0xff]   ;;  %v3704_v61 = vld [vmem:[#allocation9 + $0x530] ss:$8 sps:$4 sm:$0xff]   ;;  %v3709_v62 = vld [vmem:[#allocation9 + $0x634] ss:$8 sps:$4 sm:$0xff]  }
 0x295   : > { %2699 = vmatpush1.bf16.msra.mxu1 %v3680_v42  ;;  %v3707_v15 = vld [vmem:[#allocation9 + $0x630] ss:$8 sps:$4 sm:$0xff]   ;;  %v3712_v63 = vld [vmem:[#allocation9 + $0x524] ss:$8 sps:$4 sm:$0xff]   ;;  %v3710_v1 = vld [vmem:[#allocation9 + $0x520] ss:$8 sps:$4 sm:$0xff]  }
 0x296   : > { %1993 = vmatpush1.bf16.msra.mxu0 %v3658_v25  ;;  %2700 = vmatprep.subr.bf16.mxu1 %v3688_v45  ;;  %v3715_v2 = vld [vmem:[#allocation9 + $0x624] ss:$8 sps:$4 sm:$0xff]   ;;  %v3713_v3 = vld [vmem:[#allocation9 + $0x620] ss:$8 sps:$4 sm:$0xff]   ;;  %v3718_v20 = vld [vmem:[#allocation9 + $0x514] ss:$8 sps:$4 sm:$0xff]  }
 0x297   : > { %1994 = vmatprep.subr.bf16.mxu0 %v3663_v26  ;;  %v3716_v4 = vld [vmem:[#allocation9 + $0x510] ss:$8 sps:$4 sm:$0xff]   ;;  %v3721_v7 = vld [vmem:[#allocation9 + $0x614] ss:$8 sps:$4 sm:$0xff]   ;;  %v3724_v10 = vld [vmem:[#allocation9 + $0x504] ss:$8 sps:$4 sm:$0xff]  }
 0x298   : > { %v3719_v8 = vld [vmem:[#allocation9 + $0x610] ss:$8 sps:$4 sm:$0xff]   ;;  %v3722_v12 = vld [vmem:[#allocation9 + $0x500] ss:$8 sps:$4 sm:$0xff]   ;;  %v3727_v13 = vld [vmem:[#allocation9 + $0x604] ss:$8 sps:$4 sm:$0xff]  }
 0x299   : > { %2701 = vmatpush1.bf16.msra.mxu1 %v3686_v46  ;;  %v3725_v14 = vld [vmem:[#allocation9 + $0x600] ss:$8 sps:$4 sm:$0xff]   ;;  %v3730_v16 = vld [vmem:[#allocation9 + $0x5f4] ss:$8 sps:$4 sm:$0xff]   ;;  %v3728_v17 = vld [vmem:[#allocation9 + $0x5f0] ss:$8 sps:$4 sm:$0xff]  }
 0x29a   : > { %1995 = vmatpush1.bf16.msra.mxu0 %v3661_v27  ;;  %2702 = vmatprep.subr.bf16.mxu1 %v3694_v49  ;;  %v3733_v18 = vld [vmem:[#allocation9 + $0x6f4] ss:$8 sps:$4 sm:$0xff]   ;;  %v3731_v19 = vld [vmem:[#allocation9 + $0x6f0] ss:$8 sps:$4 sm:$0xff]   ;;  %v3736_v21 = vld [vmem:[#allocation9 + $0x5e4] ss:$8 sps:$4 sm:$0xff]  }
 0x29b   : > { %1996 = vmatprep.subr.bf16.mxu0 %v3666_v28  ;;  %v3734_v24 = vld [vmem:[#allocation9 + $0x5e0] ss:$8 sps:$4 sm:$0xff]   ;;  %v3739_v26 = vld [vmem:[#allocation9 + $0x6e4] ss:$8 sps:$4 sm:$0xff]   ;;  %v3742_v27 = vld [vmem:[#allocation9 + $0x5d4] ss:$8 sps:$4 sm:$0xff]  }
 0x29c   : > { %v3737_v25 = vld [vmem:[#allocation9 + $0x6e0] ss:$8 sps:$4 sm:$0xff]   ;;  %v3740_v28 = vld [vmem:[#allocation9 + $0x5d0] ss:$8 sps:$4 sm:$0xff]   ;;  %v3760_v41 = vld [vmem:[#allocation9 + $0x5a4] ss:$8 sps:$4 sm:$0xff]  }
 0x29d   : > { %2703 = vmatpush1.bf16.msra.mxu1 %v3692_v50  ;;  %v3763_v42 = vld [vmem:[#allocation9 + $0x6a4] ss:$8 sps:$4 sm:$0xff]   ;;  %v3766_v45 = vld [vmem:[#allocation9 + $0x594] ss:$8 sps:$4 sm:$0xff]  }
 0x29e   : > { %1997 = vmatpush1.bf16.msra.mxu0 %v3664_v29  ;;  %2704 = vmatprep.subr.bf16.mxu1 %v3700_v54  ;;  %v3745_v29 = vld [vmem:[#allocation9 + $0x6d4] ss:$8 sps:$4 sm:$0xff]   ;;  %v3772_v49 = vld [vmem:[#allocation9 + $0x584] ss:$8 sps:$4 sm:$0xff]  }
 0x29f   : > { %1998 = vmatprep.subr.bf16.mxu0 %v3669_v30  ;;  %v3743_v30 = vld [vmem:[#allocation9 + $0x6d0] ss:$8 sps:$4 sm:$0xff]   ;;  %v3769_v46 = vld [vmem:[#allocation9 + $0x694] ss:$8 sps:$4 sm:$0xff]   ;;  %v3775_v50 = vld [vmem:[#allocation9 + $0x684] ss:$8 sps:$4 sm:$0xff]  }
 0x2a0   : > { %v3784_v54 = vld [vmem:[#allocation9 + $0x774] ss:$8 sps:$4 sm:$0xff]  }
 0x2a1   : > { %2705 = vmatpush1.bf16.msra.mxu1 %v3698_v55 }
 0x2a2   : > { %1999 = vmatpush1.bf16.msra.mxu0 %v3667_v31  ;;  %2706 = vmatprep.subr.bf16.mxu1 %v3706_v60  ;;  %v3748_v31 = vld [vmem:[#allocation9 + $0x5c4] ss:$8 sps:$4 sm:$0xff]  }
 0x2a3   : > { %2000 = vmatprep.subr.bf16.mxu0 %v3672_v32  ;;  %v3751_v32 = vld [vmem:[#allocation9 + $0x6c4] ss:$8 sps:$4 sm:$0xff]  }
 0x2a5   : > { %2707 = vmatpush1.bf16.msra.mxu1 %v3704_v61 }
 0x2a6   : > { %2001 = vmatpush1.bf16.msra.mxu0 %v3670_v33  ;;  %2708 = vmatprep.subr.bf16.mxu1 %v3712_v63  ;;  %v3746_v33 = vld [vmem:[#allocation9 + $0x5c0] ss:$8 sps:$4 sm:$0xff]  }
 0x2a7   : > { %2002 = vmatprep.subr.bf16.mxu0 %v3675_v34  ;;  %v3749_v34 = vld [vmem:[#allocation9 + $0x6c0] ss:$8 sps:$4 sm:$0xff]  }
 0x2a9   : > { %2709 = vmatpush1.bf16.msra.mxu1 %v3710_v1 }
 0x2aa   : > { %2003 = vmatpush1.bf16.msra.mxu0 %v3673_v35  ;;  %2710 = vmatprep.subr.bf16.mxu1 %v3718_v20  ;;  %v3754_v35 = vld [vmem:[#allocation9 + $0x5b4] ss:$8 sps:$4 sm:$0xff]  }
 0x2ab   : > { %2004 = vmatprep.subr.bf16.mxu0 %v3678_v36  ;;  %v3757_v36 = vld [vmem:[#allocation9 + $0x6b4] ss:$8 sps:$4 sm:$0xff]  }
 0x2ad   : > { %2711 = vmatpush1.bf16.msra.mxu1 %v3716_v4 }
 0x2ae   : > { %2005 = vmatpush1.bf16.msra.mxu0 %v3676_v39  ;;  %2712 = vmatprep.subr.bf16.mxu1 %v3724_v10  ;;  %v3752_v39 = vld [vmem:[#allocation9 + $0x5b0] ss:$8 sps:$4 sm:$0xff]  }
 0x2af   : > { %2741 = vmatprep.subr.bf16.mxu0 %v3685_v43  ;;  %v3758_v43 = vld [vmem:[#allocation9 + $0x5a0] ss:$8 sps:$4 sm:$0xff]  }
 0x2b1   : > { %2023 = vmatmul.mubr.bf16.vlgmr.msra.gmra.mxu0 %v3679_v40  ;;  %2713 = vmatpush1.bf16.msra.mxu1 %v3722_v12  ;;  %v3755_v40 = vld [vmem:[#allocation9 + $0x6b0] ss:$8 sps:$4 sm:$0xff]  }
 0x2b2   : > { %2742 = vmatpush1.bf16.msra.mxu0 %v3683_v44  ;;  %2714 = vmatprep.subr.bf16.mxu1 %v3730_v16  ;;  %v3761_v44 = vld [vmem:[#allocation9 + $0x6a0] ss:$8 sps:$4 sm:$0xff]  }
 0x2b3   : > { %2743 = vmatprep.subr.bf16.mxu0 %v3691_v47  ;;  %v3764_v47 = vld [vmem:[#allocation9 + $0x590] ss:$8 sps:$4 sm:$0xff]  }
 0x2b5   : > { %2715 = vmatpush2.bf16.msra.mxu1 %v3728_v17 }
 0x2b6   : > { %2744 = vmatpush1.bf16.msra.mxu0 %v3689_v48  ;;  %2716 = vmatprep.subr.bf16.mxu1 %v3736_v21  ;;  %v3767_v48 = vld [vmem:[#allocation9 + $0x690] ss:$8 sps:$4 sm:$0xff]  }
 0x2b7   : > { %2745 = vmatprep.subr.bf16.mxu0 %v3697_v51  ;;  %v3770_v51 = vld [vmem:[#allocation9 + $0x580] ss:$8 sps:$4 sm:$0xff]  }
 0x2b9   : > { %2717 = vmatpush2.bf16.msra.mxu1 %v3734_v24 }
 0x2ba   : > { %2746 = vmatpush1.bf16.msra.mxu0 %v3695_v52  ;;  %2718 = vmatprep.subr.bf16.mxu1 %v3742_v27  ;;  %v3773_v52 = vld [vmem:[#allocation9 + $0x680] ss:$8 sps:$4 sm:$0xff]  }
 0x2bb   : > { %2747 = vmatprep.subr.bf16.mxu0 %v3703_v57 }
 0x2bd   : > { %2719 = vmatpush2.bf16.msra.mxu1 %v3740_v28 }
 0x2be   : > { %2748 = vmatpush1.bf16.msra.mxu0 %v3701_v58  ;;  %2720 = vmatprep.subr.bf16.mxu1 %v3748_v31  ;;  %v3118_v58 = vld [vmem:[%s4398_s4 + $0x2] sm:$0x3] }
 0x2bf   : > { %2749 = vmatprep.subr.bf16.mxu0 %v3709_v62  ;;  %v1475_v61 = vrot.slane %v3118_v58, %v4257_v9 }
 0x2c1   : > { %2721 = vmatpush2.bf16.msra.mxu1 %v3746_v33 }
 0x2c2   : > { %2750 = vmatpush1.bf16.msra.mxu0 %v3707_v15  ;;  %2722 = vmatprep.subr.bf16.mxu1 %v3754_v35 }
 0x2c3   : > { %2751 = vmatprep.subr.bf16.mxu0 %v3715_v2 }
 0x2c5   : > { %2723 = vmatpush2.bf16.msra.mxu1 %v3752_v39 }
 0x2c6   : > { %2752 = vmatpush1.bf16.msra.mxu0 %v3713_v3  ;;  %2724 = vmatprep.subr.bf16.mxu1 %v3760_v41 }
 0x2c7   : > { %2753 = vmatprep.subr.bf16.mxu0 %v3721_v7 }
 0x2c9   : > { %2725 = vmatpush2.bf16.msra.mxu1 %v3758_v43 }
 0x2ca   : > { %2754 = vmatpush1.bf16.msra.mxu0 %v3719_v8  ;;  %2726 = vmatprep.subr.bf16.mxu1 %v3766_v45 }
 0x2cb   : > { %2755 = vmatprep.subr.bf16.mxu0 %v3727_v13 }
 0x2cd   : > { %2727 = vmatpush2.bf16.msra.mxu1 %v3764_v47 }
 0x2ce   : > { %2756 = vmatpush1.bf16.msra.mxu0 %v3725_v14  ;;  %2728 = vmatprep.subr.bf16.mxu1 %v3772_v49 }
 0x2cf   : > { %2757 = vmatprep.subr.bf16.mxu0 %v3733_v18 }
 0x2d1   : > { %2729 = vmatpush2.bf16.msra.mxu1 %v3770_v51 }
 0x2d2   : > { %2758 = vmatpush2.bf16.msra.mxu0 %v3731_v19  ;;  %2784 = vmatprep.subr.bf16.mxu1 %v3784_v54 }
 0x2d3   : > { %2759 = vmatprep.subr.bf16.mxu0 %v3739_v26 }
 0x2d6   : > { %2760 = vmatpush2.bf16.msra.mxu0 %v3737_v25  ;;  %v1471_v25 = vrot.slane %v3118_v58, %v4263_v37 }
 0x2d7   : > { %2761 = vmatprep.subr.bf16.mxu0 %v3745_v29 }
 0x2da   : > { %2762 = vmatpush2.bf16.msra.mxu0 %v3743_v30 }
 0x2db   : > { %2763 = vmatprep.subr.bf16.mxu0 %v3751_v32 }
 0x2de   : > { %2764 = vmatpush2.bf16.msra.mxu0 %v3749_v34 }
 0x2df   : > { %2765 = vmatprep.subr.bf16.mxu0 %v3757_v36 }
 0x2e2   : > { %2766 = vmatpush2.bf16.msra.mxu0 %v3755_v40 }
 0x2e3   : > { %2767 = vmatprep.subr.bf16.mxu0 %v3763_v42 }
 0x2e6   : > { %2768 = vmatpush2.bf16.msra.mxu0 %v3761_v44 }
 0x2e7   : > { %2769 = vmatprep.subr.bf16.mxu0 %v3769_v46 }
 0x2ea   : > { %2770 = vmatpush2.bf16.msra.mxu0 %v3767_v48 }
 0x2eb   : > { %2771 = vmatprep.subr.bf16.mxu0 %v3775_v50 }
 0x2ee   : > { %2772 = vmatpush2.bf16.msra.mxu0 %v3773_v52 }
 0x351   : > { %v1938_v55 = vpop.f32.mrf.mxu0 }
 0x352   : > { %v1939_v27 = vadd.f32 %v1938_v55, %v1471_v25 }
 0x353   : > { %v1940_v57 = vpop.f32.mrf.mxu0 }
 0x354   : > { %v1981_v60 = vpop.f32.mrf.mxu1  ;;  %v1941_v63 = vadd.f32 %v1940_v57, %v1475_v61 }
 0x355   : > { %v1942_v62 = vpop.f32.mrf.mxu0  ;;  %v1982_v28 = vadd.f32 %v1981_v60, %v1939_v27 }
 0x356   : > { %v1983_v15 = vpop.f32.mrf.mxu1  ;;  %v1943_v29 = vadd.f32 %v1942_v62, %v1471_v25 }
 0x357   : > { %v1944_v1 = vpop.f32.mrf.mxu0  ;;  %v1984_v20 = vadd.f32 %v1983_v15, %v1941_v63 }
 0x358   : > { %v1985_v2 = vpop.f32.mrf.mxu1  ;;  %v1945_v4 = vadd.f32 %v1944_v1, %v1475_v61 }
 0x359   : > { %v1986_v32 = vadd.f32 %v1985_v2, %v1943_v29 }
 0x35a   : > { %v1987_v10 = vpop.f32.mrf.mxu1 }
 0x35b   : > { %v1988_v13 = vadd.f32 %v1987_v10, %v1945_v4 }
 0x371   : > { %v2024_v3 = vpop.f32.mrf.mxu0 }
 0x372   : > { %v2025_v30 = vadd.f32 %v2024_v3, %v1982_v28 }
 0x373   : > { %v2026_v7 = vpop.f32.mrf.mxu0 }
 0x374   : > { %v2027_v8 = vadd.f32 %v2026_v7, %v1984_v20 }
 0x375   : > { %v2028_v12 = vpop.f32.mrf.mxu0 }
 0x376   : > { %v3204_v14 = vmul.f32 -1.442695, %v2027_v8  ;;  %v2029_v35 = vadd.f32 %v2028_v12, %v1986_v32 }
 0x377   : > { %v2030_v16 = vpop.f32.mrf.mxu0 }
 0x378   : > { %3815 = vpow2.f32 %v3204_v14  ;;  %v2031_v17 = vadd.f32 %v2030_v16, %v1988_v13 }
 0x37a   : > { %v3205_v18 = vmul.f32 -1.442695, %v2031_v17 }
 0x37c   : > { %3817 = vpow2.f32 %v3205_v18 }
 0x385   : > { %v3816_v19 = vpop.eup %3815 }
 0x386   : > { %v2039_v21 = vadd.f32 1.0, %v3816_v19 }
 0x388   : > { %3819 = vrcp.f32 %v2039_v21 }
 0x389   : > { %v3818_v24 = vpop.eup %3817 }
 0x38a   : > { %v2040_v26 = vadd.f32 1.0, %v3818_v24 }
 0x38c   : > { %3821 = vrcp.f32 %v2040_v26 }
 0x395   : > { %v3820_v31 = vpop.eup %3819 }
 0x396   : > { %v2045_v33 = vmul.f32 %v3820_v31, %v2025_v30 }
 0x398   : > { %v2047_v34 = vadd.f32 %v2045_v33, %v4267_v53 }
 0x399   : > { %v3822_v36 = vpop.eup %3821 }
 0x39a   : > { %v4301_v39 = vmul.f32 0.70710677, %v2047_v34  ;;  %v2046_v40 = vmul.f32 %v3822_v36, %v2029_v35 }
 0x39c   : > { %v3311_v41 = vpack.c.bf16 %v4301_v39, %v4301_v39  ;;  %v2048_v42 = vadd.f32 %v2046_v40, %v4272_v59 }
 0x39e   : > { %v2057_v43 = vrot.slane %v3311_v41, 7  ;;  %v4306_v44 = vmul.f32 0.70710677, %v2048_v42 }
 0x3a0   : > { %2065 = vst [vmem:[#allocation2] sm:$0xe] %v2057_v43  ;;  %v3312_v45 = vpack.c.bf16 %v4306_v44, %v4306_v44  ;;  %v2058_v46 = vrot.slane %v2057_v43, 4 }
 0x3a2   : > { %v2059_v47 = vrot.slane %v3312_v45, 7 }
 0x3a4   : > { %v2060_v53 = vsel %vm4209_vm3, %v2058_v46, %v2059_v47  ;;  %v2061_v48 = vrot.slane %v2059_v47, 4 }
 0x3a5   : > { %2066 = vst [vmem:[#allocation2 + $0x4] sm:$0xf] %v2060_v53 }
 0x3a6   : > { %2067 = vst [vmem:[#allocation2 + $0x8] sm:$0x1] %v2061_v48 }
 0x3a7   : > { %v2068_v49 = vld [vmem:[#allocation2] sm:$0xf] }
 0x3a8   : > { %v2072_v50 = vld [vmem:[#allocation2] sm:$0xf]  ;;  %2070 = vst [vmem:[#allocation3] sm:$0xf] %v2068_v49 }
 0x3a9   : > { %v2076_v51 = vshrl.u32 %v2072_v50, 16  ;;  %v2079_v59 = vshll.u32 %v2072_v50, 16  ;;  %v2103_v52 = vld [vmem:[#allocation2] sm:$0xe] }
 0x3aa   : > { %v2120_v54 = vld [vmem:[#allocation2] sm:$0xe]  ;;  %v3208_v61 = vrot.slane %v2103_v52, 9 }
 0x3ab   : > { %v2124_v55 = vshrl.u32 %v2120_v54, 16  ;;  %v2127_v57 = vshll.u32 %v2120_v54, 16  ;;  %v2078_v58 = vrot.slane %v2076_v51, 4  ;;  %v2081_v60 = vrot.slane %v2079_v59, 5  ;;  %v2155_v63 = vld [vmem:[#allocation2] sm:$0xc] }
 0x3ac   : > { %v2069_v23 = vld [vmem:[#allocation2 + $0x4] sm:$0xf]  ;;  %v3209_v17 = vrot.slane %v2155_v63, 10  ;;  %v3793_v63 = vld [vmem:[#allocation9 + $0x744] ss:$8 sps:$4 sm:$0xff]  }
 0x3ad   : > { %v2126_v62 = vrot.slane %v2124_v55, 5  ;;  %v2129_v15 = vrot.slane %v2127_v57, 6  ;;  %v2073_v1 = vld [vmem:[#allocation2 + $0x4] sm:$0xf]  ;;  %v2082_v2 = vor.u32 %v2081_v60, %v2078_v58  ;;  %2071 = vst [vmem:[#allocation3 + $0x14] sm:$0xf] %v2069_v23 }
 0x3ae   : > { %v2104_v3 = vld [vmem:[#allocation2 + $0x4] sm:$0xf]  ;;  %v2074_v20 = vld [vmem:[#allocation2 + $0x8] sm:$0x1]  ;;  %v2085_v4 = vshll.u32 %v2073_v1, 16  ;;  %v2089_v7 = vshrl.u32 %v2073_v1, 16 }
 0x3af   : > { %v2105_v8 = vld [vmem:[#allocation2 + $0x8] sm:$0x1]  ;;  %v2130_v10 = vor.u32 %v2129_v15, %v2126_v62  ;;  %v2083_v12 = vrot.slane %v2082_v2, 4  ;;  %v2111_v13 = vrot.slane %v2104_v3, 5  ;;  %v2121_v16 = vld [vmem:[#allocation2 + $0x4] sm:$0xf] }
 0x3b0   : > { %v2114_v14 = vrot.slane %v2105_v8, 5  ;;  %v2087_v18 = vrot.slane %v2085_v4, 5  ;;  %v2091_v19 = vrot.slane %v2089_v7, 4  ;;  %v2095_v21 = vshll.u32 %v2074_v20, 16  ;;  %v2122_v24 = vld [vmem:[#allocation2 + $0x8] sm:$0x3] }
 0x3b1   : > { %v2133_v25 = vshrl.u32 %v2121_v16, 16  ;;  %v2112_v26 = vsel %vm4223_vm13, %v3208_v61, %v2111_v13  ;;  %v2113_v27 = vrot.slane %v2111_v13, 4  ;;  %v2131_v28 = vrot.slane %v2130_v10, 4  ;;  %v2156_v30 = vld [vmem:[#allocation2 + $0x4] sm:$0xf] }
 0x3b2   : > { %v2136_v29 = vshll.u32 %v2121_v16, 16  ;;  %v2088_v31 = vsel %vm4217_vm12, %v2083_v12, %v2087_v18  ;;  %v2092_v32 = vor.u32 %v2091_v19, %v2087_v18  ;;  %2118 = vst [vmem:[#allocation3 + $0x8] sm:$0xf] %v2112_v26  ;;  %v2143_v34 = vshrl.u32 %v2122_v24, 16  ;;  %v2157_v35 = vld [vmem:[#allocation2 + $0x8] sm:$0x3] }
 0x3b3   : > { %v2135_v33 = vrot.slane %v2133_v25, 5  ;;  %2101 = vst [vmem:[#allocation3 + $0x4] sm:$0xf] %v2088_v31  ;;  %v2115_v36 = vsel %vm4223_vm13, %v2113_v27, %v2114_v14  ;;  %v2146_v41 = vshll.u32 %v2122_v24, 16  ;;  %v2163_v42 = vrot.slane %v2156_v30, 6 }
 0x3b4   : > { %v2138_v40 = vrot.slane %v2136_v29, 6  ;;  %v2093_v43 = vrot.slane %v2092_v32, 4  ;;  %v2097_v45 = vrot.slane %v2095_v21, 5  ;;  %2119 = vst [vmem:[#allocation3 + $0x1c] sm:$0xf] %v2115_v36  ;;  %v2145_v46 = vrot.slane %v2143_v34, 5 }
 0x3b5   : > { %v2166_v47 = vrot.slane %v2157_v35, 6  ;;  %v2148_v48 = vrot.slane %v2146_v41, 6  ;;  %v2164_v49 = vsel %vm4231_vm14, %v3209_v17, %v2163_v42  ;;  %v2165_v50 = vrot.slane %v2163_v42, 4  ;;  %v3782_v57 = vld [vmem:[#allocation9 + $0x770] ss:$8 sps:$4 sm:$0xff]  }
 0x3b6   : > { %v2139_v53 = vor.u32 %v2138_v40, %v2135_v33  ;;  %v2098_v51 = vsel %vm4217_vm12, %v2093_v43, %v2097_v45  ;;  %2170 = vst [vmem:[#allocation3 + $0x10] sm:$0xf] %v2164_v49  ;;  %v3776_v58 = vld [vmem:[#allocation3] ss:$20 sps:$4 sm:$0xff]   ;;  %v3787_v60 = vld [vmem:[#allocation9 + $0x764] ss:$8 sps:$4 sm:$0xff]  }
 0x3b7   : > { %2102 = vst [vmem:[#allocation3 + $0x18] sm:$0xf] %v2098_v51  ;;  %v2149_v52 = vor.u32 %v2148_v48, %v2145_v46  ;;  %v2167_v54 = vsel %vm4231_vm14, %v2165_v50, %v2166_v47  ;;  %v3785_v15 = vld [vmem:[#allocation9 + $0x760] ss:$8 sps:$4 sm:$0xff]   ;;  %v3796_v1 = vld [vmem:[#allocation9 + $0x734] ss:$8 sps:$4 sm:$0xff]  }
 0x3b8   : > { %v2140_v5 = vsel %vm4241_vm15, %v2131_v28, %v2139_v53  ;;  %v2141_v59 = vrot.slane %v2139_v53, 4  ;;  %2171 = vst [vmem:[#allocation3 + $0x24] sm:$0xf] %v2167_v54  ;;  %v3791_v23 = vld [vmem:[#allocation9 + $0x740] ss:$8 sps:$4 sm:$0xff]  }
 0x3b9   : > { %2153 = vst [vmem:[#allocation3 + $0xc] sm:$0xf] %v2140_v5  ;;  %v3794_v2 = vld [vmem:[#allocation9 + $0x730] ss:$8 sps:$4 sm:$0xff]   ;;  %v3799_v3 = vld [vmem:[#allocation9 + $0x724] ss:$8 sps:$4 sm:$0xff]  }
 0x3ba   : > { %v2150_v55 = vsel %vm4241_vm15, %v2141_v59, %v2149_v52  ;;  %v3797_v20 = vld [vmem:[#allocation9 + $0x720] ss:$8 sps:$4 sm:$0xff]   ;;  %v3800_v4 = vld [vmem:[#allocation9 + $0x710] ss:$8 sps:$4 sm:$0xff]   ;;  %v3805_v7 = vld [vmem:[#allocation9 + $0x704] ss:$8 sps:$4 sm:$0xff]  }
 0x3bb   : > { %2154 = vst [vmem:[#allocation3 + $0x20] sm:$0xf] %v2150_v55  ;;  %v3779_v61 = vld [vmem:[#allocation3 + $0x8] ss:$20 sps:$4 sm:$0xff]   ;;  %v3803_v8 = vld [vmem:[#allocation9 + $0x700] ss:$8 sps:$4 sm:$0xff]  }
 0x3bc   : > { %v3210_v14 = vld [vmem:[%s4398_s4 + $0x4] sm:$0x3] }
 0x3bd   : > { %v2269_v17 = vrot.slane %v3210_v14, %v4257_v9  ;;  %v2265_v43 = vrot.slane %v3210_v14, %v4263_v37  ;;  %v2854_v37 = vand.u32 127, %v674_v6 }
 0x3be   : > { %v3778_v56 = vld [vmem:[#allocation3 + $0x4] ss:$20 sps:$4 sm:$0xff]  }
 0x3bf   : > { %2730 = vmatprep.mubr.bf16.mxu1 %v3778_v56  ;;  %v3806_v10 = vld [vmem:[#allocation3 + $0x10] ss:$20 sps:$4 sm:$0xff]   ;;  %vm2855_vm0 = vcmp.lt.s32.totalorder %v2854_v37, 32 }
 0x3c0   : > { %2731 = vmatmul.mubr.bf16.vlgmr.msra.gmra.mxu1 %v3776_v58 }
 0x3c1   : > { %2785 = vmatpush1.bf16.msra.mxu1 %v3782_v57  ;;  %2816 = vmatprep.mubr.bf16.mxu1 %v3994_v38  ;;  %v3802_v38 = vld [vmem:[#allocation9 + $0x714] ss:$8 sps:$4 sm:$0xff]  }
 0x3c2   : > { %v3781_v62 = vld [vmem:[#allocation3 + $0xc] ss:$20 sps:$4 sm:$0xff]   ;;  %2786 = vmatprep.subr.bf16.mxu1 %v3787_v60 }
 0x3c3   : > { %2773 = vmatprep.mubr.bf16.mxu0 %v3781_v62 }
 0x3c4   : > { %2774 = vmatmul.mubr.bf16.vlgmr.msra.gmra.mxu0 %v3779_v61  ;;  %v3298_v61 = vsel %vm2855_vm0, 1.0, %v3992_v0 }
 0x3c5   : > { %2787 = vmatpush1.bf16.msra.mxu1 %v3785_v15 }
 0x3c6   : > { %2788 = vmatprep.subr.bf16.mxu1 %v3790_v11 }
 0x3c9   : > { %2789 = vmatpush1.bf16.msra.mxu1 %v3788_v22 }
 0x3ca   : > { %2790 = vmatprep.subr.bf16.mxu1 %v3793_v63 }
 0x3cd   : > { %2791 = vmatpush1.bf16.msra.mxu1 %v3791_v23 }
 0x3ce   : > { %2792 = vmatprep.subr.bf16.mxu1 %v3796_v1 }
 0x3d1   : > { %2793 = vmatpush1.bf16.msra.mxu1 %v3794_v2 }
 0x3d2   : > { %2794 = vmatprep.subr.bf16.mxu1 %v3799_v3 }
 0x3d5   : > { %2795 = vmatpush1.bf16.msra.mxu1 %v3797_v20 }
 0x3d6   : > { %2796 = vmatprep.subr.bf16.mxu1 %v3802_v38 }
 0x3d9   : > { %2797 = vmatpush1.bf16.msra.mxu1 %v3800_v4  ;;  %v3299_v4 = vld [vmem:[%s4399_s5] ss:$0 sm:$0xff] }
 0x3da   : > { %2798 = vmatprep.subr.bf16.mxu1 %v3805_v7 }
 0x3dd   : > { %2799 = vmatpush1.bf16.msra.mxu1 %v3803_v8  ;;  %v3300_v8 = vld [vmem:[%s4400_s6] ss:$0 sm:$0xff] }
 0x3e0   : > { %2817 = vmatmul.mubr.bf16.vlgmr.msra.gmra.mxu1 %v3806_v10 }
 0x480   : > { %v2732_v12 = vpop.f32.mrf.mxu1 }
 0x481   : > { %v2733_v46 = vadd.f32 %v2732_v12, %v2265_v43 }
 0x482   : > { %v2734_v13 = vpop.f32.mrf.mxu1 }
 0x483   : > { %v2735_v21 = vadd.f32 %v2734_v13, %v2269_v17 }
 0x484   : > { %v2775_v16 = vpop.f32.mrf.mxu0  ;;  %v2736_v18 = vpop.f32.mrf.mxu1 }
 0x485   : > { %v2776_v47 = vadd.f32 %v2775_v16, %v2733_v46  ;;  %v2737_v53 = vadd.f32 %v2736_v18, %v2265_v43 }
 0x486   : > { %v2777_v19 = vpop.f32.mrf.mxu0  ;;  %v2738_v24 = vpop.f32.mrf.mxu1 }
 0x487   : > { %v2778_v27 = vadd.f32 %v2777_v19, %v2735_v21  ;;  %v2739_v28 = vadd.f32 %v2738_v24, %v2269_v17 }
 0x488   : > { %v2779_v25 = vpop.f32.mrf.mxu0 }
 0x489   : > { %v2780_v50 = vadd.f32 %v2779_v25, %v2737_v53 }
 0x48a   : > { %v2781_v31 = vpop.f32.mrf.mxu0 }
 0x48b   : > { %v2782_v33 = vadd.f32 %v2781_v31, %v2739_v28 }
 0x4a0   : > { %v2818_v26 = vpop.f32.mrf.mxu1 }
 0x4a1   : > { %v2819_v48 = vadd.f32 %v2818_v26, %v2776_v47 }
 0x4a2   : > { %v2820_v29 = vpop.f32.mrf.mxu1 }
 0x4a3   : > { %v2821_v30 = vadd.f32 %v2820_v29, %v2778_v27 }
 0x4a4   : > { %v2822_v32 = vpop.f32.mrf.mxu1 }
 0x4a5   : > { %v3296_v34 = vmul.f32 -1.442695, %v2821_v30  ;;  %v2823_v5 = vadd.f32 %v2822_v32, %v2780_v50 }
 0x4a6   : > { %v2824_v35 = vpop.f32.mrf.mxu1 }
 0x4a7   : > { %3823 = vpow2.f32 %v3296_v34  ;;  %v2825_v36 = vadd.f32 %v2824_v35, %v2782_v33 }
 0x4a9   : > { %v3297_v40 = vmul.f32 -1.442695, %v2825_v36 }
 0x4ab   : > { %3825 = vpow2.f32 %v3297_v40 }
 0x4b4   : > { %v3824_v9 = vpop.eup %3823 }
 0x4b5   : > { %v2833_v41 = vadd.f32 1.0, %v3824_v9 }
 0x4b7   : > { %3827 = vrcp.f32 %v2833_v41 }
 0x4b8   : > { %v3826_v42 = vpop.eup %3825 }
 0x4b9   : > { %v2834_v45 = vadd.f32 1.0, %v3826_v42 }
 0x4bb   : > { %3829 = vrcp.f32 %v2834_v45 }
 0x4c4   : > { %v3828_v49 = vpop.eup %3827 }
 0x4c5   : > { %v2839_v51 = vmul.f32 %v3828_v49, %v2819_v48 }
 0x4c7   : > { %v2841_v59 = vadd.f32 %v2839_v51, %v4301_v39 }
 0x4c8   : > { %v3830_v52 = vpop.eup %3829 }
 0x4c9   : > { %v2843_v54 = vmul.f32 0.70710677, %v2841_v59  ;;  %v2840_v55 = vmul.f32 %v3830_v52, %v2823_v5 }
 0x4cb   : > { %2845 = vadd.xlane.f32.xlu0 %v2843_v54  ;;  %v2842_v57 = vadd.f32 %v2840_v55, %v4306_v44 }
 0x4cd   : > { %v2844_v58 = vmul.f32 0.70710677, %v2842_v57 }
 0x4cf   : > { %2847 = vadd.xlane.f32.xlu0 %v2844_v58 }
 0x554   : > { %v2846_v56 = vpop.xlane.xlu0 %2845 }
 0x555   : > { %v2849_v60 = vmul.f32 0.03125, %v2846_v56 }
 0x557   : > { %v2851_v62 = vsub.f32 %v2843_v54, %v2849_v60 }
 0x558   : > { %v2848_v15 = vpop.xlane.xlu0 %2847 }
 0x559   : > { %v2850_v11 = vmul.f32 0.03125, %v2848_v15  ;;  %v2858_v22 = vmul.f32 %v3298_v61, %v2851_v62 }
 0x55b   : > { %v2852_v39 = vsub.f32 %v2844_v58, %v2850_v11  ;;  %v2860_v63 = vmul.f32 %v2858_v22, %v2858_v22 }
 0x55d   : > { %2862 = vadd.xlane.f32.xlu1 %v2860_v63  ;;  %v2859_v23 = vmul.f32 %v3298_v61, %v2852_v39 }
 0x55f   : > { %v2861_v1 = vmul.f32 %v2859_v23, %v2859_v23 }
 0x561   : > { %2864 = vadd.xlane.f32.xlu1 %v2861_v1 }
 0x5e6   : > { %v2863_v44 = vpop.xlane.xlu1 %2862 }
 0x5e7   : > { %v2866_v2 = vmul.f32 0.03125, %v2863_v44 }
 0x5e9   : > { %v2868_v6 = vadd.f32 1e-05, %v2866_v2 }
 0x5ea   : > { %v2865_v3 = vpop.xlane.xlu1 %2864 }
 0x5eb   : > { %3831 = vrsqrt.f32 %v2868_v6  ;;  %v2867_v20 = vmul.f32 0.03125, %v2865_v3 }
 0x5ed   : > { %v2869_v38 = vadd.f32 1e-05, %v2867_v20 }
 0x5ef   : > { %3833 = vrsqrt.f32 %v2869_v38 }
 0x5f8   : > { %v3832_v0 = vpop.eup %3831 }
 0x5f9   : > { %v2872_v7 = vmul.f32 %v3832_v0, %v2858_v22 }
 0x5fb   : > { %v2881_v10 = vmul.f32 %v3299_v4, %v2872_v7 }
 0x5fc   : > { %v3834_v12 = vpop.eup %3833 }
 0x5fd   : > { %v2890_v13 = vadd.f32 %v3300_v8, %v2881_v10  ;;  %v2873_v14 = vmul.f32 %v3834_v12, %v2859_v23 }
 0x5ff   : > { %v2882_v16 = vmul.f32 %v3299_v4, %v2873_v14  ;;  %2892 = vst [vmem:[%s325_s30] sm:$0xff] %v2890_v13 }
 0x601   : > { %v2891_v17 = vadd.f32 %v3300_v8, %v2882_v16 }
 0x603   : > { %2893 = vst [vmem:[%s325_s30 + $0x8] sm:$0xff] %v2891_v17 }
 0x604   : > { %3928 = shalt.err (!%p3925_p3)
}
 0x605   : > { %s3929_s16 = scalar_lea.hbm %s4349_s11, 256  ;;  %s3933_s19 = scalar_lea.hbm %s4401_s7, 512 }
 0x606   : > { %p3930_p11 = scmp.ne.s32.totalorder %s4349_s11, %s3929_s16  ;;  %p3934_p4 = scmp.lt.s32.totalorder %s4349_s11, %s4401_s7 }
 0x607   : > { %p3935_p6 = scmp.lt.s32.totalorder %s3933_s19, %s3929_s16 }
 0x608   : > { %p3931_p9 = pnand %p3930_p11, %p4432_p2 }
 0x609   : > { %p3936_p8 = por %p3935_p6, %p3934_p4 }
 0x60a   : > { %p3932_p1 = pneg %p3931_p9 }
 0x60c   : > { %p3937_p10 = pnand %p3936_p8, %p3932_p1 }
 0x60e   : > { %3940 = shalt.err (!%p3937_p10)
}
 0x60f   : > { %s3996_s22 = smov 128   ;;  %s3997_s29 = smov 8  }
 0x610   : > { %3353 = dma.vmem_to_hbm [thread:$0]  (%p4432_p2), %s4351_s9, 256, %s4349_s11, %s2895_s13, %s3996_s22, %s3996_s22, %s3997_s29  }
 0x611 PF: > { %s2923_s23 = sand.u32 1, %s3971_s24   ;;  %p4433_p7 = scmp.ne.s32.totalorder %s4410_s8, 0 }
 0x612   : > { %p4434_p12 = scmp.ge.s32.totalorder %s3983_s27, 2  ;;  %s2924_s28 = scalar_lea.sflag [#allocation6], %s2923_s23 }
 0x614   : > { %p3367_p13 = pnand %p4434_p12, %p4433_p7 }
 0x616   : > { %p3368_p0 = pneg %p3367_p13 }
 0x618   : > { %3966 = dma.done.wait (%p3368_p0), %s2924_s28, 256  }
 0x619   : > { %3968 = vsyncadd (%p3368_p0), %s2924_s28, 4294967040  ;;  %p21_p5 = scmp.ge.s32.totalorder %s4113_s10, 4   ;;  %s4435_s24 = smov %s3975_s25 }
 0x61a   : > { %s4436_s25 = smov %s3979_s26  ;;  %s4437_s26 = smov %s4122_s15 }
 0x61b   : > { %s4438_s27 = smov %s4113_s10  ;;  %23 = sbr.rel (!%p21_p5) target bundleno = 8 (0x8), region = 105 }
 0x620   :  { %2929 = vsyncpa [#allocation5], 1 }
 0x621   :  { %2931 = vsyncpa [#allocation5 + $0x1], 1 }
 0x622   :  { %2932 = vsyncpa [#allocation8], 1 }
 0x623   :  { %2933 = vsyncpa [#allocation6], 1 }
 0x624   :  { %2935 = vsyncpa [#allocation6 + $0x1], 1 }

</bundles_post_ra>
